<compile_context>
chip_gen: v5e
topology: v5e:2x2
jax: 0.10.0
libtpu: 0.0.40
codegen_flags: <defaults>
</compile_context>

<pallas_src>
import jax
import jax.numpy as jnp
from jax import lax
from jax.experimental import pallas as pl
from jax.experimental.pallas import tpu as pltpu


# ---------------------------------------------------------------- kernel 1 --
def conv3x3_bnstats_kernel(xp_ref, w_ref, y_ref, sum_ref, ssq_ref):
    """3x3 conv (stride 1, input pre-padded by 1) + BN partial sums.

    xp_ref : (1, H+2, W+2, Cin)  padded NHWC input tile (one batch element)
    w_ref  : (9*Cin, C1)         tap-folded weights, row order (kh, kw, cin)
    y_ref  : (1, C1, H*W)        conv output, channel-major (lane-dense)
    sum_ref: (1, C1, 1)          per-batch per-channel sum
    ssq_ref: (1, C1, 1)          per-batch per-channel sum of squares
    """
    Cin = xp_ref.shape[3]
    H = xp_ref.shape[1] - 2
    W = xp_ref.shape[2] - 2
    HW = H * W

    x = xp_ref[0]                                            # (H+2, W+2, Cin)

    # im2col with the 3x3 taps folded into the contraction dim.
    # Column order is (kh, kw, cin) to match the folded weight rows.
    # Only 3 sublane-shifted slices (one per kw); kh slices are tile selects.
    x_kw = jnp.concatenate([x[:, kw:kw + W, :] for kw in range(3)],
                           axis=-1)                          # (H+2, W, 3*Cin)
    patch = jnp.concatenate(
        [x_kw[kh:kh + H].reshape(HW, 3 * Cin) for kh in range(3)],
        axis=-1)                                             # (H*W, 9*Cin)

    # Single MXU pass with K = 9*Cin.
    y = jnp.dot(patch, w_ref[...],
                preferred_element_type=jnp.float32)          # (H*W, C1)
    yt = y.T                                                 # (C1, H*W) dense

    y_ref[0] = yt
    sum_ref[0] = jnp.sum(yt, axis=1, keepdims=True)
    ssq_ref[0] = jnp.sum(yt * yt, axis=1, keepdims=True)


# ---------------------------------------------------------------- kernel 2 --
def bn_lrelu_conv1x1_kernel(y_ref, scale_ref, shift_ref, w_ref, b_ref, o_ref):
    """Fused BatchNorm affine + LeakyReLU(0.1) + 1x1 conv (with bias).

    y_ref    : (1, C1, H*W)  channel-major activations
    scale_ref: (C1, 1)       gamma / sqrt(var + eps)
    shift_ref: (C1, 1)       beta - mean * scale
    w_ref    : (C2, C1)      1x1 conv weights (PyTorch OI layout)
    b_ref    : (C2, 1)       conv bias
    o_ref    : (1, C2, H*W)  channel-major output (lane-dense)
    """
    a = y_ref[0] * scale_ref[...] + shift_ref[...]           # BN affine
    a = jnp.where(a >= 0, a, 0.1 * a)                        # LeakyReLU(0.1)
    out = jnp.dot(w_ref[...], a,
                  preferred_element_type=jnp.float32)        # (C2, H*W)
    o_ref[0] = (out + b_ref[...]).astype(o_ref.dtype)


# ----------------------------------------------------------------- wrapper --
def scale_prediction_forward(x_nchw, params, num_classes):
    """Forward pass of ScalePrediction.  x_nchw: (B, C_in, H, W) float32."""
    B, Cin, H, W = x_nchw.shape
    C1 = 2 * Cin
    C2 = 3 * (num_classes + 5)
    HW = H * W
    eps = 1e-5

    w1 = params["w1"]          # (C1, Cin, 3, 3)  PyTorch OIHW
    gamma = params["gamma"]    # (C1,)
    beta = params["beta"]      # (C1,)
    w2 = params["w2"]          # (C2, C1, 1, 1)
    b2 = params["b2"]          # (C2,)

    # --- boundary glue: layouts / weight folding ---
    x = jnp.transpose(x_nchw, (0, 2, 3, 1))                  # NHWC
    xp = jnp.pad(x, ((0, 0), (1, 1), (1, 1), (0, 0)))        # padding=1
    # Tap-folded weights: rows ordered (kh, kw, cin), cols = cout.
    w1_folded = jnp.transpose(w1, (2, 3, 1, 0)).reshape(9 * Cin, C1)
    w2_oi = w2[:, :, 0, 0]                                   # (C2, C1)

    cparams = pltpu.CompilerParams(
        dimension_semantics=("parallel",),
        vmem_limit_bytes=32 * 1024 * 1024)   # raise when scaling H/W/channels

    # --- kernel 1: tap-folded 3x3 conv + fused BN partial sums ---
    y1t, bsum, bssq = pl.pallas_call(
        conv3x3_bnstats_kernel,
        out_shape=(
            jax.ShapeDtypeStruct((B, C1, HW), jnp.float32),
            jax.ShapeDtypeStruct((B, C1, 1), jnp.float32),
            jax.ShapeDtypeStruct((B, C1, 1), jnp.float32),
        ),
        grid_spec=pltpu.PrefetchScalarGridSpec(
            num_scalar_prefetch=0,
            grid=(B,),
            in_specs=[
                pl.BlockSpec((1, H + 2, W + 2, Cin), lambda b: (b, 0, 0, 0)),
                pl.BlockSpec((9 * Cin, C1), lambda b: (0, 0)),
            ],
            out_specs=[
                pl.BlockSpec((1, C1, HW), lambda b: (b, 0, 0)),
                pl.BlockSpec((1, C1, 1), lambda b: (b, 0, 0)),
                pl.BlockSpec((1, C1, 1), lambda b: (b, 0, 0)),
            ],
        ),
        compiler_params=cparams,
    )(xp, w1_folded)

    # --- glue: finalize BatchNorm2d training-mode batch statistics ---
    # Tiny (B, C1) reduction — no extra HBM pass over the (B, C1, H*W) slab.
    n = B * HW
    mean = jnp.sum(bsum[:, :, 0], axis=0) / n                # (C1,)
    ex2 = jnp.sum(bssq[:, :, 0], axis=0) / n                 # (C1,)
    var = jnp.maximum(ex2 - mean * mean, 0.0)                # biased variance
    scale = gamma / jnp.sqrt(var + eps)                      # (C1,)
    shift = beta - mean * scale                              # (C1,)

    # --- kernel 2: fused BN affine + LeakyReLU + 1x1 conv ---
    y2t = pl.pallas_call(
        bn_lrelu_conv1x1_kernel,
        out_shape=jax.ShapeDtypeStruct((B, C2, HW), jnp.float32),
        grid_spec=pltpu.PrefetchScalarGridSpec(
            num_scalar_prefetch=0,
            grid=(B,),
            in_specs=[
                pl.BlockSpec((1, C1, HW), lambda b: (b, 0, 0)),
                pl.BlockSpec((C1, 1), lambda b: (0, 0)),
                pl.BlockSpec((C1, 1), lambda b: (0, 0)),
                pl.BlockSpec((C2, C1), lambda b: (0, 0)),
                pl.BlockSpec((C2, 1), lambda b: (0, 0)),
            ],
            out_specs=pl.BlockSpec((1, C2, HW), lambda b: (b, 0, 0)),
        ),
        compiler_params=cparams,
    )(y1t, scale[:, None], shift[:, None], w2_oi, b2[:, None])

    # --- glue: channel-major (B, 3*(nc+5), H*W) reshapes directly to the
    # PyTorch pre-permute layout; final permute mirrors the module itself.
    out = y2t.reshape(B, 3, num_classes + 5, H, W)
    return jnp.transpose(out, (0, 1, 3, 4, 2))               # (B,3,H,W,nc+5)


# --------------------------------------------------------- pure-JAX reference
def scale_prediction_reference(x_nchw, params, num_classes):
    B, Cin, H, W = x_nchw.shape
    eps = 1e-5
    y1 = lax.conv_general_dilated(
        x_nchw, params["w1"], (1, 1), ((1, 1), (1, 1)),
        dimension_numbers=("NCHW", "OIHW", "NCHW"))
    mean = y1.mean(axis=(0, 2, 3))
    var = jnp.mean((y1 - mean[None, :, None, None]) ** 2, axis=(0, 2, 3))
    y1n = (y1 - mean[None, :, None, None]) / jnp.sqrt(var + eps)[None, :, None, None]
    y1n = y1n * params["gamma"][None, :, None, None] + params["beta"][None, :, None, None]
    a = jnp.where(y1n >= 0, y1n, 0.1 * y1n)
    y2 = lax.conv_general_dilated(
        a, params["w2"], (1, 1), ((0, 0), (0, 0)),
        dimension_numbers=("NCHW", "OIHW", "NCHW"))
    y2 = y2 + params["b2"][None, :, None, None]
    out = y2.reshape(B, 3, num_classes + 5, H, W)
    return jnp.transpose(out, (0, 1, 3, 4, 2))


# -------------------------------------------------------------------- main --
if __name__ == "__main__":
    B, Cin, H, W = 2, 4, 16, 16
    num_classes = 3
    C1 = 2 * Cin
    C2 = 3 * (num_classes + 5)

    key = jax.random.PRNGKey(0)
    kx, k1, k2, kb = jax.random.split(key, 4)

    x = jax.random.normal(kx, (B, Cin, H, W), jnp.float32)
    params = {
        "w1": jax.random.normal(k1, (C1, Cin, 3, 3), jnp.float32) * 0.1,
        "gamma": jnp.ones((C1,), jnp.float32),        # BatchNorm2d defaults
        "beta": jnp.zeros((C1,), jnp.float32),
        "w2": jax.random.normal(k2, (C2, C1, 1, 1), jnp.float32) * 0.1,
        "b2": jax.random.normal(kb, (C2,), jnp.float32) * 0.1,
    }

    out = jax.jit(scale_prediction_forward, static_argnums=2)(
        x, params, num_classes)
    out = jax.block_until_ready(out)

    ref = scale_prediction_reference(x, params, num_classes)
    assert out.shape == (B, 3, H, W, num_classes + 5), out.shape
    assert jnp.allclose(out, ref, atol=1e-4, rtol=1e-4), \
        float(jnp.max(jnp.abs(out - ref)))

    print("KERNEL_OK")
</pallas_src>

<mosaic_0001>
module attributes {stable_mosaic.version = 11 : i64} {
  func.func @bn_lrelu_conv1x1_kernel(%arg0: i32, %arg1: memref<1x8x256xf32, #tpu.memory_space<vmem>>, %arg2: memref<8x1xf32, #tpu.memory_space<vmem>>, %arg3: memref<8x1xf32, #tpu.memory_space<vmem>>, %arg4: memref<24x8xf32, #tpu.memory_space<vmem>>, %arg5: memref<24x1xf32, #tpu.memory_space<vmem>>, %arg6: memref<1x24x256xf32, #tpu.memory_space<vmem>>) attributes {dimension_semantics = [#tpu.dimension_semantics<parallel>], iteration_bounds = array<i64: 2>, scalar_prefetch = 0 : i64, scratch_operands = 0 : i64, tpu.core_type = #tpu.core_type<tc>, window_params = [{transform_indices = @transform_0, window_bounds = array<i64: 1, 8, 256>}, {pipeline_mode = #tpu.pipeline_mode<synchronous>, transform_indices = @transform_1, window_bounds = array<i64: 8, 1>}, {pipeline_mode = #tpu.pipeline_mode<synchronous>, transform_indices = @transform_2, window_bounds = array<i64: 8, 1>}, {pipeline_mode = #tpu.pipeline_mode<synchronous>, transform_indices = @transform_3, window_bounds = array<i64: 24, 8>}, {pipeline_mode = #tpu.pipeline_mode<synchronous>, transform_indices = @transform_4, window_bounds = array<i64: 24, 1>}, {transform_indices = @transform_5, window_bounds = array<i64: 1, 24, 256>}]} {
    %c0 = arith.constant 0 : index
    %c0_0 = arith.constant 0 : index
    %c0_1 = arith.constant 0 : index
    %0 = vector.load %arg1[%c0, %c0_0, %c0_1] : memref<1x8x256xf32, #tpu.memory_space<vmem>>, vector<1x8x256xf32>
    %1 = vector.shape_cast %0 : vector<1x8x256xf32> to vector<8x256xf32>
    %c0_2 = arith.constant 0 : index
    %c0_3 = arith.constant 0 : index
    %2 = vector.load %arg2[%c0_2, %c0_3] : memref<8x1xf32, #tpu.memory_space<vmem>>, vector<8x1xf32>
    %3 = vector.broadcast %2 : vector<8x1xf32> to vector<8x256xf32>
    %4 = arith.mulf %1, %3 : vector<8x256xf32>
    %c0_4 = arith.constant 0 : index
    %c0_5 = arith.constant 0 : index
    %5 = vector.load %arg3[%c0_4, %c0_5] : memref<8x1xf32, #tpu.memory_space<vmem>>, vector<8x1xf32>
    %6 = vector.broadcast %5 : vector<8x1xf32> to vector<8x256xf32>
    %7 = arith.addf %4, %6 : vector<8x256xf32>
    %cst = arith.constant 0.000000e+00 : f32
    %8 = vector.broadcast %cst : f32 to vector<8x256xf32>
    %9 = arith.cmpf oge, %7, %8 : vector<8x256xf32>
    %cst_6 = arith.constant 1.000000e-01 : f32
    %10 = vector.broadcast %cst_6 : f32 to vector<8x256xf32>
    %11 = arith.mulf %10, %7 : vector<8x256xf32>
    %12 = arith.select %9, %7, %11 : vector<8x256xi1>, vector<8x256xf32>
    %c0_7 = arith.constant 0 : index
    %c0_8 = arith.constant 0 : index
    %13 = vector.load %arg4[%c0_7, %c0_8] : memref<24x8xf32, #tpu.memory_space<vmem>>, vector<24x8xf32>
    %cst_9 = arith.constant dense<0.000000e+00> : vector<24x256xf32>
    %14 = tpu.matmul %13, %12, %cst_9 {dimension_numbers = #tpu.dot_dimension_numbers<[1], [0], [0], [1], [0, 0, 1, 1], [], []>} : vector<24x8xf32>, vector<8x256xf32>, vector<24x256xf32> -> vector<24x256xf32>
    %c0_10 = arith.constant 0 : index
    %c0_11 = arith.constant 0 : index
    %15 = vector.load %arg5[%c0_10, %c0_11] : memref<24x1xf32, #tpu.memory_space<vmem>>, vector<24x1xf32>
    %16 = vector.broadcast %15 : vector<24x1xf32> to vector<24x256xf32>
    %17 = arith.addf %14, %16 : vector<24x256xf32>
    %c0_12 = arith.constant 0 : index
    %c0_13 = arith.constant 0 : index
    %c0_14 = arith.constant 0 : index
    %18 = vector.load %arg6[%c0_12, %c0_13, %c0_14] : memref<1x24x256xf32, #tpu.memory_space<vmem>>, vector<1x24x256xf32>
    %19 = vector.shape_cast %18 : vector<1x24x256xf32> to vector<24x256xf32>
    %20 = vector.shape_cast %17 : vector<24x256xf32> to vector<1x24x256xf32>
    tpu.vector_store %arg6[%c0_12, %c0_13, %c0_14], %20 {strides = array<i32>} : memref<1x24x256xf32, #tpu.memory_space<vmem>>, vector<1x24x256xf32>,
    return
  }
  func.func @transform_0(%arg0: i32) -> (i32, i32, i32) {
    %c0_i32 = arith.constant 0 : i32
    %c0_i32_0 = arith.constant 0 : i32
    %c0_i32_1 = arith.constant 0 : i32
    return %arg0, %c0_i32, %c0_i32_0 : i32, i32, i32
  }
  func.func @transform_1(%arg0: i32) -> (i32, i32) {
    %c0_i32 = arith.constant 0 : i32
    %c0_i32_0 = arith.constant 0 : i32
    %c0_i32_1 = arith.constant 0 : i32
    return %c0_i32, %c0_i32_0 : i32, i32
  }
  func.func @transform_2(%arg0: i32) -> (i32, i32) {
    %c0_i32 = arith.constant 0 : i32
    %c0_i32_0 = arith.constant 0 : i32
    %c0_i32_1 = arith.constant 0 : i32
    return %c0_i32, %c0_i32_0 : i32, i32
  }
  func.func @transform_3(%arg0: i32) -> (i32, i32) {
    %c0_i32 = arith.constant 0 : i32
    %c0_i32_0 = arith.constant 0 : i32
    %c0_i32_1 = arith.constant 0 : i32
    return %c0_i32, %c0_i32_0 : i32, i32
  }
  func.func @transform_4(%arg0: i32) -> (i32, i32) {
    %c0_i32 = arith.constant 0 : i32
    %c0_i32_0 = arith.constant 0 : i32
    %c0_i32_1 = arith.constant 0 : i32
    return %c0_i32, %c0_i32_0 : i32, i32
  }
  func.func @transform_5(%arg0: i32) -> (i32, i32, i32) {
    %c0_i32 = arith.constant 0 : i32
    %c0_i32_0 = arith.constant 0 : i32
    %c0_i32_1 = arith.constant 0 : i32
    return %arg0, %c0_i32, %c0_i32_0 : i32, i32, i32
  }
}

module attributes {stable_mosaic.version = 11 : i64} {
  func.func @conv3x3_bnstats_kernel(%arg0: i32, %arg1: memref<1x18x18x4xf32, #tpu.memory_space<vmem>>, %arg2: memref<36x8xf32, #tpu.memory_space<vmem>>, %arg3: memref<1x8x256xf32, #tpu.memory_space<vmem>>, %arg4: memref<1x8x1xf32, #tpu.memory_space<vmem>>, %arg5: memref<1x8x1xf32, #tpu.memory_space<vmem>>) attributes {dimension_semantics = [#tpu.dimension_semantics<parallel>], iteration_bounds = array<i64: 2>, scalar_prefetch = 0 : i64, scratch_operands = 0 : i64, tpu.core_type = #tpu.core_type<tc>, window_params = [{transform_indices = @transform_0, window_bounds = array<i64: 1, 18, 18, 4>}, {pipeline_mode = #tpu.pipeline_mode<synchronous>, transform_indices = @transform_1, window_bounds = array<i64: 36, 8>}, {transform_indices = @transform_2, window_bounds = array<i64: 1, 8, 256>}, {transform_indices = @transform_3, window_bounds = array<i64: 1, 8, 1>}, {transform_indices = @transform_4, window_bounds = array<i64: 1, 8, 1>}]} {
    %c0 = arith.constant 0 : index
    %c0_0 = arith.constant 0 : index
    %c0_1 = arith.constant 0 : index
    %c0_2 = arith.constant 0 : index
    %0 = vector.load %arg1[%c0, %c0_0, %c0_1, %c0_2] : memref<1x18x18x4xf32, #tpu.memory_space<vmem>>, vector<1x18x18x4xf32>
    %1 = vector.shape_cast %0 : vector<1x18x18x4xf32> to vector<18x18x4xf32>
    %2 = vector.extract_strided_slice %1 {offsets = [0, 0, 0], sizes = [18, 16, 4], strides = [1, 1, 1]} : vector<18x18x4xf32> to vector<18x16x4xf32>
    %3 = vector.extract_strided_slice %1 {offsets = [0, 1, 0], sizes = [18, 16, 4], strides = [1, 1, 1]} : vector<18x18x4xf32> to vector<18x16x4xf32>
    %4 = vector.extract_strided_slice %1 {offsets = [0, 2, 0], sizes = [18, 16, 4], strides = [1, 1, 1]} : vector<18x18x4xf32> to vector<18x16x4xf32>
    %5 = tpu.concatenate %2, %3, %4 in 2 : vector<18x16x4xf32>, vector<18x16x4xf32>, vector<18x16x4xf32> -> vector<18x16x12xf32>
    %6 = vector.extract_strided_slice %5 {offsets = [0, 0, 0], sizes = [16, 16, 12], strides = [1, 1, 1]} : vector<18x16x12xf32> to vector<16x16x12xf32>
    %7 = vector.shape_cast %6 : vector<16x16x12xf32> to vector<256x12xf32>
    %8 = vector.extract_strided_slice %5 {offsets = [1, 0, 0], sizes = [16, 16, 12], strides = [1, 1, 1]} : vector<18x16x12xf32> to vector<16x16x12xf32>
    %9 = vector.shape_cast %8 : vector<16x16x12xf32> to vector<256x12xf32>
    %10 = vector.extract_strided_slice %5 {offsets = [2, 0, 0], sizes = [16, 16, 12], strides = [1, 1, 1]} : vector<18x16x12xf32> to vector<16x16x12xf32>
    %11 = vector.shape_cast %10 : vector<16x16x12xf32> to vector<256x12xf32>
    %12 = tpu.concatenate %7, %9, %11 in 1 : vector<256x12xf32>, vector<256x12xf32>, vector<256x12xf32> -> vector<256x36xf32>
    %c0_3 = arith.constant 0 : index
    %c0_4 = arith.constant 0 : index
    %13 = vector.load %arg2[%c0_3, %c0_4] : memref<36x8xf32, #tpu.memory_space<vmem>>, vector<36x8xf32>
    %cst = arith.constant dense<0.000000e+00> : vector<256x8xf32>
    %14 = tpu.matmul %12, %13, %cst {dimension_numbers = #tpu.dot_dimension_numbers<[1], [0], [0], [1], [0, 0, 1, 1], [], []>} : vector<256x36xf32>, vector<36x8xf32>, vector<256x8xf32> -> vector<256x8xf32>
    %15 = tpu.transpose %14, [1, 0] : vector<256x8xf32> -> vector<8x256xf32>
    %c0_5 = arith.constant 0 : index
    %c0_6 = arith.constant 0 : index
    %c0_7 = arith.constant 0 : index
    %16 = vector.load %arg3[%c0_5, %c0_6, %c0_7] : memref<1x8x256xf32, #tpu.memory_space<vmem>>, vector<1x8x256xf32>
    %17 = vector.shape_cast %16 : vector<1x8x256xf32> to vector<8x256xf32>
    %18 = vector.shape_cast %15 : vector<8x256xf32> to vector<1x8x256xf32>
    tpu.vector_store %arg3[%c0_5, %c0_6, %c0_7], %18 {strides = array<i32>} : memref<1x8x256xf32, #tpu.memory_space<vmem>>, vector<1x8x256xf32>,
    %cst_8 = arith.constant dense<0.000000e+00> : vector<8xf32>
    %19 = vector.multi_reduction <add>, %15, %cst_8 [1] : vector<8x256xf32> to vector<8xf32>
    %20 = vector.shape_cast %19 : vector<8xf32> to vector<8x1xf32>
    %c0_9 = arith.constant 0 : index
    %c0_10 = arith.constant 0 : index
    %c0_11 = arith.constant 0 : index
    %21 = vector.load %arg4[%c0_9, %c0_10, %c0_11] : memref<1x8x1xf32, #tpu.memory_space<vmem>>, vector<1x8x1xf32>
    %22 = vector.shape_cast %21 : vector<1x8x1xf32> to vector<8x1xf32>
    %23 = vector.shape_cast %20 : vector<8x1xf32> to vector<1x8x1xf32>
    tpu.vector_store %arg4[%c0_9, %c0_10, %c0_11], %23 {strides = array<i32>} : memref<1x8x1xf32, #tpu.memory_space<vmem>>, vector<1x8x1xf32>,
    %24 = arith.mulf %15, %15 : vector<8x256xf32>
    %cst_12 = arith.constant dense<0.000000e+00> : vector<8xf32>
    %25 = vector.multi_reduction <add>, %24, %cst_12 [1] : vector<8x256xf32> to vector<8xf32>
    %26 = vector.shape_cast %25 : vector<8xf32> to vector<8x1xf32>
    %c0_13 = arith.constant 0 : index
    %c0_14 = arith.constant 0 : index
    %c0_15 = arith.constant 0 : index
    %27 = vector.load %arg5[%c0_13, %c0_14, %c0_15] : memref<1x8x1xf32, #tpu.memory_space<vmem>>, vector<1x8x1xf32>
    %28 = vector.shape_cast %27 : vector<1x8x1xf32> to vector<8x1xf32>
    %29 = vector.shape_cast %26 : vector<8x1xf32> to vector<1x8x1xf32>
    tpu.vector_store %arg5[%c0_13, %c0_14, %c0_15], %29 {strides = array<i32>} : memref<1x8x1xf32, #tpu.memory_space<vmem>>, vector<1x8x1xf32>,
    return
  }
  func.func @transform_0(%arg0: i32) -> (i32, i32, i32, i32) {
    %c0_i32 = arith.constant 0 : i32
    %c0_i32_0 = arith.constant 0 : i32
    %c0_i32_1 = arith.constant 0 : i32
    %c0_i32_2 = arith.constant 0 : i32
    return %arg0, %c0_i32, %c0_i32_0, %c0_i32_1 : i32, i32, i32, i32
  }
  func.func @transform_1(%arg0: i32) -> (i32, i32) {
    %c0_i32 = arith.constant 0 : i32
    %c0_i32_0 = arith.constant 0 : i32
    %c0_i32_1 = arith.constant 0 : i32
    return %c0_i32, %c0_i32_0 : i32, i32
  }
  func.func @transform_2(%arg0: i32) -> (i32, i32, i32) {
    %c0_i32 = arith.constant 0 : i32
    %c0_i32_0 = arith.constant 0 : i32
    %c0_i32_1 = arith.constant 0 : i32
    return %arg0, %c0_i32, %c0_i32_0 : i32, i32, i32
  }
  func.func @transform_3(%arg0: i32) -> (i32, i32, i32) {
    %c0_i32 = arith.constant 0 : i32
    %c0_i32_0 = arith.constant 0 : i32
    %c0_i32_1 = arith.constant 0 : i32
    return %arg0, %c0_i32, %c0_i32_0 : i32, i32, i32
  }
  func.func @transform_4(%arg0: i32) -> (i32, i32, i32) {
    %c0_i32 = arith.constant 0 : i32
    %c0_i32_0 = arith.constant 0 : i32
    %c0_i32_1 = arith.constant 0 : i32
    return %arg0, %c0_i32, %c0_i32_0 : i32, i32, i32
  }
}

</mosaic_0001>

<bundles_post_ra>
// kernel: scale_prediction_forward.3
= control target key start
LH: loop header
LB: loop body
LE: loop exit
PB: predicated region body
PF: predicated region fallthrough
CT: control target
= control target key end

     0   :  { %s464_s18 = smov 0   ;;  %s509_s0 = inlined_call_operand.vmem [shape: f32[2,8,256], index: 0, kind: input, shape index: {}]   ;;  %s510_s1 = inlined_call_operand.vmem [shape: f32[8,1], index: 1, kind: input, shape index: {}]   ;;  %s511_s2 = inlined_call_operand.vmem [shape: f32[8,1], index: 2, kind: input, shape index: {}]   ;;  %s512_s3 = inlined_call_operand.vmem [shape: f32[24,8], index: 3, kind: input, shape index: {}]   ;;  %s513_s4 = inlined_call_operand.vmem [shape: f32[24,1], index: 4, kind: input, shape index: {}]   ;;  %s514_s5 = inlined_call_operand.vmem [shape: f32[2,24,256], index: 5, kind: output, shape index: {}]  }
   0x1 LB: > { %s393_s19 = sadd.s32 4294967295, %s431_s18   ;;  %p397_p0 = scmp.ge.s32.totalorder %s431_s18, 1  ;;  %s431_s18 = sphi %s464_s18, %s15_s18  }
   0x2   : > { %p187_p1 = scmp.lt.s32.totalorder %s431_s18, 3 }
   0x4   : > { %p188_p2 = pnand %p397_p0, %p187_p1 }
   0x5   : > { %p215_p3 = scmp.lt.s32.totalorder (!%p188_p2), %s393_s19, 1 }
   0x6   : > { %191 = sbr.rel (%p188_p2) target bundleno = 287 (0x11f), region = 40 }
   0xb   : > { %v227_v0 = vld [vmem:[%s510_s1] sm:$0xff]  ;;  %v433_v1 = vmov 0   ;;  %v254_v4 = vld [vmem:[%s513_s4 + $0x10] sm:$0xff]  ;;  %s516_s19 = smov (!%p215_p3, %s393_s19), 1  ;;  %v253_v5 = vld [vmem:[%s513_s4 + $0x8] sm:$0xff]  ;;  %vm270_vm2 = vcmask 64512  }
   0xc   : > { %422 = vset.pattern.permute.xlu0 %v433_v1  ;;  %423 = vset.pattern.permute.xlu1 %v433_v1  ;;  %v235_v2 = vld [vmem:[%s511_s2] sm:$0xff]  ;;  %s409_s28 = sshll.u32 %s516_s19, 4  ;;  %v250_v18 = vld [vmem:[%s512_s3 + $0x8] sm:$0xff]  ;;  %v251_v20 = vld [vmem:[%s512_s3 + $0x10] sm:$0xff]  ;;  %s412_s15 = smul.u32 48, %s516_s19 }
   0xd   : > { %230 = vperm.xlu0 %422, %v227_v0   ;;  %424 = vset.pattern.permute.xlu2 %v433_v1  ;;  %v252_v3 = vld [vmem:[%s513_s4] sm:$0xff]  ;;  %s219_s8 = scalar_lea.vmem %s509_s0, %s409_s28 }
   0xe   : > { %257 = vperm.xlu1 %423, %v252_v3   ;;  %267 = vperm.xlu2 %424, %v254_v4   ;;  %v225_v7 = vld [vmem:[%s219_s8] sm:$0xff]  ;;  %v226_v8 = vld [vmem:[%s219_s8 + $0x8] sm:$0xff]  ;;  %s224_s20 = scalar_lea.vmem %s514_s5, %s412_s15 }
   0xf   : > { %v249_v19 = vld [vmem:[%s512_s3] sm:$0xff] }
  0x15   : > { %238 = vperm.xlu0 %422, %v235_v2  }
  0x16   : > { %262 = vperm.xlu1 %423, %v253_v5  }
  0x68   : > { %v268_v31 = vpop.permute.xlu2 %267 }
  0x7f   : > { %v231_v6 = vpop.permute.xlu0 %230 }
  0x80   : > { %v233_v9 = vmul.f32 %v231_v6, %v225_v7  ;;  %v234_v10 = vmul.f32 %v231_v6, %v226_v8  ;;  %v258_v21 = vpop.permute.xlu1 %257 }
  0x87   : > { %v239_v11 = vpop.permute.xlu0 %238 }
  0x88   : > { %v241_v12 = vadd.f32 %v239_v11, %v233_v9  ;;  %v242_v13 = vadd.f32 %v239_v11, %v234_v10  ;;  %v263_v26 = vpop.permute.xlu1 %262 }
  0x8a   : > { %vm243_vm0 = vcmp.ge.f32.partialorder %v241_v12, 0.0  ;;  %v245_v14 = vmul.f32 0.1, %v241_v12  ;;  %vm244_vm1 = vcmp.ge.f32.partialorder %v242_v13, 0.0  ;;  %v246_v15 = vmul.f32 0.1, %v242_v13 }
  0x8c   : > { %v247_v16 = vsel %vm243_vm0, %v241_v12, %v245_v14  ;;  %v248_v17 = vsel %vm244_vm1, %v242_v13, %v246_v15 }
  0x8d   : > { %295 = vmatpush.msra.mxu0 %v247_v16  ;;  %410 = vmatpush.msra.mxu2 %v247_v16 }
  0x8e   : > { %321 = vmatpush.msra.mxu1 %v248_v17  ;;  %411 = vmatpush.msra.mxu3 %v248_v17 }
  0x8f   : > { %402 = vmatmul.msk.f32.vlgmr.msra.gmra.mxu2 %vm270_vm2, %v250_v18  ;;  %405 = vmatmul.msk.f32.vlgmr.msra.gmra.mxu3 %vm270_vm2, %v250_v18 }
  0x90   : > { %401 = vmatmul.msk.f32.vlgmr.msra.gmra.mxu0 %vm270_vm2, %v249_v19  ;;  %404 = vmatmul.msk.f32.vlgmr.msra.gmra.mxu1 %vm270_vm2, %v249_v19 }
  0x97   : > { %403 = vmatmul.msk.f32.gmra.mxu2 %vm270_vm2, %v251_v20  ;;  %406 = vmatmul.msk.f32.gmra.mxu3 %vm270_vm2, %v251_v20 }
 0x10d   : > { %v297_v22 = vpop.f32.mrf.mxu0  ;;  %v323_v23 = vpop.f32.mrf.mxu1 }
 0x10e   : > { %v298_v24 = vadd.f32 %v297_v22, %v258_v21  ;;  %v324_v25 = vadd.f32 %v323_v23, %v258_v21 }
 0x110   : > { %332 = vst [vmem:[%s224_s20] sm:$0xff] %v298_v24 }
 0x111   : > { %333 = vst [vmem:[%s224_s20 + $0x8] sm:$0xff] %v324_v25 }
 0x112   : > { %v300_v27 = vpop.f32.mrf.mxu2  ;;  %v326_v28 = vpop.f32.mrf.mxu3 }
 0x113   : > { %v301_v29 = vadd.f32 %v300_v27, %v263_v26  ;;  %v327_v30 = vadd.f32 %v326_v28, %v263_v26 }
 0x115   : > { %334 = vst [vmem:[%s224_s20 + $0x10] sm:$0xff] %v301_v29 }
 0x116   : > { %335 = vst [vmem:[%s224_s20 + $0x18] sm:$0xff] %v327_v30 }
 0x11a   : > { %v303_v32 = vpop.f32.mrf.mxu2  ;;  %v329_v33 = vpop.f32.mrf.mxu3 }
 0x11b   : > { %v304_v34 = vadd.f32 %v303_v32, %v268_v31  ;;  %v330_v35 = vadd.f32 %v329_v33, %v268_v31 }
 0x11d   : > { %336 = vst [vmem:[%s224_s20 + $0x20] sm:$0xff] %v304_v34 }
 0x11e   : > { %337 = vst [vmem:[%s224_s20 + $0x28] sm:$0xff] %v330_v35 }
 0x11f PF: > { %s15_s18 = sadd.s32 1, %s431_s18  }
 0x120   : > { %p12_p4 = scmp.ge.s32.totalorder %s15_s18, 4  }
 0x122   :  { %14 = sbr.rel (!%p12_p4) target bundleno = 1 (0x1), region = 70 }

// kernel: scale_prediction_forward.2
= control target key start
LH: loop header
LB: loop body
LE: loop exit
PB: predicated region body
PF: predicated region fallthrough
CT: control target
= control target key end

     0   :  { %s1615_s15 = smov 0   ;;  %s2626_s0 = inlined_call_operand.vmem [shape: f32[2,18,18,4], index: 0, kind: input, shape index: {}]   ;;  %s2627_s1 = inlined_call_operand.vmem [shape: f32[36,8], index: 1, kind: input, shape index: {}]   ;;  %s2628_s2 = inlined_call_operand.vmem [shape: f32[2,8,256], index: 2, kind: output, shape index: {0}]   ;;  %s2629_s3 = inlined_call_operand.vmem [shape: f32[2,8,1], index: 3, kind: output, shape index: {1}]   ;;  %s2630_s4 = inlined_call_operand.vmem [shape: f32[2,8,1], index: 4, kind: output, shape index: {2}]  }
   0x1 LB: > { %s1504_s16 = sadd.s32 4294967295, %s1584_s15   ;;  %p1508_p0 = scmp.ge.s32.totalorder %s1584_s15, 1  ;;  %s1584_s15 = sphi %s1615_s15, %s15_s15  }
   0x2   : > { %p167_p1 = scmp.lt.s32.totalorder %s1584_s15, 3 }
   0x4   : > { %p168_p2 = pnand %p1508_p0, %p167_p1 }
   0x6   : > { %171 = sbr.rel (%p168_p2) target bundleno = 857 (0x359), region = 28 }
   0xb   : > { %p201_p3 = scmp.lt.s32.totalorder %s1504_s16, 1  ;;  %vm327_vm0 = vcmask 1046528   ;;  %s1586_s21 = smov 4   ;;  %vm526_vm1 = vcmask 1045504   ;;  %vm762_vm2 = vcmask 64512   ;;  %vm725_vm3 = vcmask 31744  }
   0xc   : > { %s1587_s22 = smov 8   ;;  %s1588_s23 = smov 12   ;;  %vm1193_vm4 = vcmask 1043456   ;;  %vm1025_vm5 = vcmask 97280   ;;  %vm1058_vm6 = vcmask 195584   ;;  %vm1096_vm7 = vcmask 293888  }
   0xd   : > { %s2678_s16 = smov (!%p201_p3, %s1504_s16), 1  ;;  %s1589_s24 = smov 24   ;;  %vm1379_vm8 = vcmask 7168  }
   0xe   : > { %s1565_s17 = smul.u32 432, %s2678_s16  ;;  %s1549_s9 = sshll.u32 %s2678_s16, 4 }
   0xf   : > { %s210_s12 = scalar_lea.vmem %s2628_s2, %s1549_s9  ;;  %s1512_s13 = sshll.u32 %s2678_s16, 3 }
  0x10   : > { %s1629_s20 = scalar_lea.vmem %s2626_s0, %s1565_s17  ;;  %s214_s18 = scalar_lea.vmem %s2629_s3, %s1512_s13 }
  0x11   : > { %v1632_v0 = vld [vmem:[%s1629_s20 + $0x30] sm:$0xff]  ;;  %v1635_v1 = vld [vmem:[%s1629_s20 + $0x38] sm:$0xff]  ;;  %v1643_v5 = vld [vmem:[%s1629_s20 + $0x20] sm:$0xff] }
  0x12   : > { %v1638_v2 = vld [vmem:[%s1629_s20 + $0x18] sm:$0xff]  ;;  %v338_v3 = vrot.slane %v1632_v0, 1  ;;  %v339_v4 = vrot.slane %v1635_v1, 1  ;;  %v1647_v7 = vld [vmem:[%s1629_s20] sm:$0xff]  ;;  %v1650_v8 = vld [vmem:[%s1629_s20 + $0x8] sm:$0xff]  ;;  %v334_v9 = vrot.slane %v1643_v5, 1 }
  0x13   : > { %v333_v6 = vrot.slane %v1638_v2, 1  ;;  %v328_v10 = vrot.slane %v1647_v7, 1  ;;  %v329_v11 = vrot.slane %v1650_v8, 1  ;;  %v1656_v12 = vld [vmem:[%s1629_s20 + $0x40] sm:$0x3]  ;;  %v1680_v25 = vld [vmem:[%s1629_s20 + $0x68] sm:$0xff] }
  0x14   : > { %v340_v13 = vsel %vm327_vm0, %v338_v3, %v339_v4  ;;  %v1660_v14 = vld [vmem:[%s1629_s20 + $0x28] sm:$0x3]  ;;  %v1663_v15 = vld [vmem:[%s1629_s20 + $0x10] sm:$0x3]  ;;  %v341_v18 = vrot.slane %v1656_v12, 1  ;;  %v1677_v24 = vld [vmem:[%s1629_s20 + $0x60] sm:$0xff] }
  0x15   : > { %426 = vrot.lane.b32.xlu2 %v340_v13, %s1586_s21  ;;  %v335_v16 = vsel %vm327_vm0, %v333_v6, %v334_v9  ;;  %v330_v17 = vsel %vm327_vm0, %v328_v10, %v329_v11  ;;  %v336_v19 = vrot.slane %v1660_v14, 1  ;;  %v331_v20 = vrot.slane %v1663_v15, 1  ;;  %v1683_v26 = vld [vmem:[%s1629_s20 + $0x50] sm:$0xff]  ;;  %v1686_v27 = vld [vmem:[%s1629_s20 + $0x58] sm:$0x3]  ;;  %v1689_v28 = vld [vmem:[%s1629_s20 + $0x48] sm:$0xff] }
  0x16   : > { %422 = vrot.lane.b32.xlu1 %v335_v16, %s1586_s21  ;;  %418 = vrot.lane.b32.xlu0 %v330_v17, %s1586_s21  ;;  %v342_v21 = vsel %vm327_vm0, %v339_v4, %v341_v18  ;;  %v348_v29 = vrot.slane %v1677_v24, 1  ;;  %v349_v30 = vrot.slane %v1680_v25, 1  ;;  %v344_v31 = vrot.slane %v1683_v26, 1  ;;  %v1703_v37 = vld [vmem:[%s1629_s20 + $0x80] sm:$0xff]  ;;  %v1706_v38 = vld [vmem:[%s1629_s20 + $0x88] sm:$0x3] }
  0x17   : > { %v337_v22 = vsel %vm327_vm0, %v334_v9, %v336_v19  ;;  %v332_v23 = vsel %vm327_vm0, %v329_v11, %v331_v20  ;;  %v346_v32 = vrot.slane %v1686_v27, 1  ;;  %v343_v33 = vrot.slane %v1689_v28, 1  ;;  %v1709_v39 = vld [vmem:[%s1629_s20 + $0x78] sm:$0xff]  ;;  %v1712_v40 = vld [vmem:[%s1629_s20 + $0x70] sm:$0x3]  ;;  %v1725_v48 = vld [vmem:[%s1629_s20 + $0xa8] sm:$0xff] }
  0x18   : > { %v350_v34 = vsel %vm327_vm0, %v348_v29, %v349_v30  ;;  %v354_v41 = vrot.slane %v1703_v37, 1  ;;  %v356_v42 = vrot.slane %v1706_v38, 1  ;;  %v353_v43 = vrot.slane %v1709_v39, 1  ;;  %v1728_v49 = vld [vmem:[%s1629_s20 + $0xb0] sm:$0xff]  ;;  %v1731_v50 = vld [vmem:[%s1629_s20 + $0x98] sm:$0xff]  ;;  %v1751_v61 = vld [vmem:[%s1629_s20 + $0xc8] sm:$0xff] }
  0x19   : > { %v347_v35 = vsel %vm327_vm0, %v344_v31, %v346_v32  ;;  %v345_v36 = vsel %vm327_vm0, %v343_v33, %v344_v31  ;;  %v351_v44 = vrot.slane %v1712_v40, 1  ;;  %2646 = vst [vmem:[#allocation2_spill] sm:$0xff] %v1728_v49  ;;  %v1734_v51 = vld [vmem:[%s1629_s20 + $0xa0] sm:$0x3]  ;;  %v1737_v52 = vld [vmem:[%s1629_s20 + $0x90] sm:$0xff]  ;;  %v363_v53 = vrot.slane %v1725_v48, 1 }
  0x1a   : > { %v357_v45 = vsel %vm327_vm0, %v354_v41, %v356_v42  ;;  %v355_v46 = vsel %vm327_vm0, %v353_v43, %v354_v41  ;;  %2647 = vst [vmem:[#allocation3_spill] sm:$0xff] %v1731_v50  ;;  %v364_v54 = vrot.slane %v1728_v49, 1  ;;  %v359_v55 = vrot.slane %v1731_v50, 1  ;;  %v1754_v62 = vld [vmem:[%s1629_s20 + $0xd0] sm:$0x3]  ;;  %v1757_v63 = vld [vmem:[%s1629_s20 + $0xc0] sm:$0xff] }
  0x1b   : > { %v352_v47 = vsel %vm327_vm0, %v349_v30, %v351_v44  ;;  %2648 = vst [vmem:[#allocation4_spill] sm:$0xff] %v1737_v52  ;;  %v361_v56 = vrot.slane %v1734_v51, 1  ;;  %v358_v57 = vrot.slane %v1737_v52, 1  ;;  %v1760_v3 = vld [vmem:[%s1629_s20 + $0xb8] sm:$0x3]  ;;  %v369_v4 = vrot.slane %v1751_v61, 1 }
  0x1c   : > { %v365_v58 = vsel %vm327_vm0, %v363_v53, %v364_v54  ;;  %v371_v6 = vrot.slane %v1754_v62, 1  ;;  %v368_v9 = vrot.slane %v1757_v63, 1  ;;  %v366_v10 = vrot.slane %v1760_v3, 1  ;;  %v1773_v17 = vld [vmem:[%s1629_s20 + $0xf0] sm:$0xff]  ;;  %v1776_v18 = vld [vmem:[%s1629_s20 + $0xf8] sm:$0xff]  ;;  %v1779_v19 = vld [vmem:[%s1629_s20 + $0xe0] sm:$0xff] }
  0x1d   : > { %428 = vrot.lane.b32.xlu2 %v342_v21, %s1586_s21  ;;  %v362_v59 = vsel %vm327_vm0, %v359_v55, %v361_v56  ;;  %v360_v60 = vsel %vm327_vm0, %v358_v57, %v359_v55  ;;  %2649 = vst [vmem:[#allocation5_spill] sm:$0xff] %v1776_v18  ;;  %v1782_v20 = vld [vmem:[%s1629_s20 + $0xe8] sm:$0x3]  ;;  %v1785_v21 = vld [vmem:[%s1629_s20 + $0xd8] sm:$0xff]  ;;  %v374_v29 = vrot.slane %v1779_v19, 1  ;;  %v1824_v56 = vld [vmem:[%s1629_s20 + $0x140] sm:$0xff] }
  0x1e   : > { %424 = vrot.lane.b32.xlu1 %v337_v22, %s1586_s21  ;;  %420 = vrot.lane.b32.xlu0 %v332_v23, %s1586_s21  ;;  %v372_v11 = vsel %vm327_vm0, %v369_v4, %v371_v6  ;;  %v370_v13 = vsel %vm327_vm0, %v368_v9, %v369_v4  ;;  %v367_v16 = vsel %vm327_vm0, %v364_v54, %v366_v10  ;;  %v378_v22 = vrot.slane %v1773_v17, 1  ;;  %v1805_v41 = vld [vmem:[%s1629_s20 + $0x108] sm:$0xff]  ;;  %v1808_v42 = vld [vmem:[%s1629_s20 + $0x100] sm:$0x3] }
  0x1f   : > { %2650 = vst [vmem:[#allocation6_spill] sm:$0xff] %v1779_v19  ;;  %v379_v23 = vrot.slane %v1776_v18, 1  ;;  %v376_v30 = vrot.slane %v1782_v20, 1  ;;  %v373_v31 = vrot.slane %v1785_v21, 1  ;;  %v1821_v55 = vld [vmem:[%s1629_s20 + $0x138] sm:$0xff]  ;;  %v1827_v57 = vld [vmem:[%s1629_s20 + $0x128] sm:$0xff] }
  0x20   : > { %2651 = vst [vmem:[#allocation7_spill] sm:$0xff] %v1785_v21  ;;  %v394_v4 = vrot.slane %v1824_v56, 1  ;;  %v389_v6 = vrot.slane %v1827_v57, 1 }
  0x21   : > { %v380_v32 = vsel %vm327_vm0, %v378_v22, %v379_v23  ;;  %v377_v33 = vsel %vm327_vm0, %v374_v29, %v376_v30  ;;  %2652 = vst [vmem:[#allocation8_spill] sm:$0xff] %v1821_v55  ;;  %v1847_v22 = vld [vmem:[%s1629_s20 + $0x158] sm:$0xff]  ;;  %v1856_v30 = vld [vmem:[%s1629_s20 + $0x148] sm:$0x3] }
  0x22   : > { %2653 = vst [vmem:[#allocation9_spill] sm:$0xff] %v1824_v56 }
  0x23   : > { %2654 = vst [vmem:[#allocation10_spill] sm:$0xff] %v1827_v57 }
  0x24   : > { %2655 = vst [vmem:[#allocation11_spill] sm:$0xff] %v1847_v22 }
  0x25   : > { %434 = vrot.lane.b32.xlu2 %v350_v34, %s1586_s21  ;;  %v375_v34 = vsel %vm327_vm0, %v373_v31, %v374_v29  ;;  %v1853_v29 = vld [vmem:[%s1629_s20 + $0x150] sm:$0xff]  ;;  %v399_v31 = vrot.slane %v1847_v22, 1 }
  0x26   : > { %432 = vrot.lane.b32.xlu1 %v347_v35, %s1586_s21  ;;  %430 = vrot.lane.b32.xlu0 %v345_v36, %s1586_s21  ;;  %v1799_v35 = vld [vmem:[%s1629_s20 + $0x110] sm:$0xff]  ;;  %v1802_v36 = vld [vmem:[%s1629_s20 + $0x118] sm:$0x3] }
  0x27   : > { %v384_v43 = vrot.slane %v1799_v35, 1  ;;  %v386_v44 = vrot.slane %v1802_v36, 1 }
  0x2d   : > { %440 = vrot.lane.b32.xlu2 %v357_v45, %s1586_s21  ;;  %v383_v45 = vrot.slane %v1805_v41, 1 }
  0x2e   : > { %438 = vrot.lane.b32.xlu1 %v355_v46, %s1586_s21  ;;  %436 = vrot.lane.b32.xlu0 %v352_v47, %s1586_s21  ;;  %v381_v46 = vrot.slane %v1808_v42, 1  ;;  %v387_v47 = vsel %vm327_vm0, %v384_v43, %v386_v44 }
  0x2f   : > { %v385_v53 = vsel %vm327_vm0, %v383_v45, %v384_v43 }
  0x30   : > { %v382_v54 = vsel %vm327_vm0, %v379_v23, %v381_v46  ;;  %v1850_v23 = vld [vmem:[%s1629_s20 + $0x160] sm:$0x3] }
  0x31   : > { %v1869_v46 = vld [vmem:[%s1629_s20 + $0x180] sm:$0xff] }
  0x35   : > { %446 = vrot.lane.b32.xlu2 %v365_v58, %s1586_s21  ;;  %v1830_v58 = vld [vmem:[%s1629_s20 + $0x130] sm:$0x3] }
  0x36   : > { %444 = vrot.lane.b32.xlu1 %v362_v59, %s1586_s21  ;;  %442 = vrot.lane.b32.xlu0 %v360_v60, %s1586_s21  ;;  %v1833_v59 = vld [vmem:[%s1629_s20 + $0x120] sm:$0xff]  ;;  %v393_v60 = vrot.slane %v1821_v55, 1  ;;  %v391_v9 = vrot.slane %v1830_v58, 1 }
  0x37   : > { %v388_v10 = vrot.slane %v1833_v59, 1 }
  0x3d   : > { %452 = vrot.lane.b32.xlu2 %v372_v11, %s1586_s21  ;;  %v395_v11 = vsel %vm327_vm0, %v393_v60, %v394_v4  ;;  %v1881_v60 = vld [vmem:[%s1629_s20 + $0x168] sm:$0xff] }
  0x3e   : > { %450 = vrot.lane.b32.xlu1 %v370_v13, %s1586_s21  ;;  %448 = vrot.lane.b32.xlu0 %v367_v16, %s1586_s21  ;;  %v392_v13 = vsel %vm327_vm0, %v389_v6, %v391_v9  ;;  %v390_v16 = vsel %vm327_vm0, %v388_v10, %v389_v6  ;;  %2658 = vst [vmem:[#allocation14_spill] sm:$0xff] %v1881_v60 }
  0x45   : > { %458 = vrot.lane.b32.xlu2 %v380_v32, %s1586_s21  ;;  %v401_v32 = vrot.slane %v1850_v23, 1 }
  0x46   : > { %456 = vrot.lane.b32.xlu1 %v377_v33, %s1586_s21  ;;  %454 = vrot.lane.b32.xlu0 %v375_v34, %s1586_s21  ;;  %v398_v33 = vrot.slane %v1853_v29, 1  ;;  %v396_v34 = vrot.slane %v1856_v30, 1 }
  0x47   : > { %v402_v43 = vsel %vm327_vm0, %v399_v31, %v401_v32  ;;  %v1895_v32 = vld [vmem:[%s1629_s20 + $0x1a0] sm:$0xff] }
  0x48   : > { %v400_v44 = vsel %vm327_vm0, %v398_v33, %v399_v31  ;;  %v397_v45 = vsel %vm327_vm0, %v394_v4, %v396_v34  ;;  %v408_v4 = vrot.slane %v1869_v46, 1  ;;  %v1898_v33 = vld [vmem:[%s1629_s20 + $0x1a8] sm:$0x3]  ;;  %v1901_v34 = vld [vmem:[%s1629_s20 + $0x198] sm:$0xff] }
  0x4d   : > { %464 = vrot.lane.b32.xlu2 %v387_v47, %s1586_s21  ;;  %v1872_v47 = vld [vmem:[%s1629_s20 + $0x188] sm:$0xff] }
  0x4e   : > { %462 = vrot.lane.b32.xlu1 %v385_v53, %s1586_s21  ;;  %460 = vrot.lane.b32.xlu0 %v382_v54, %s1586_s21  ;;  %2656 = vst [vmem:[#allocation12_spill] sm:$0xff] %v1872_v47  ;;  %v1875_v53 = vld [vmem:[%s1629_s20 + $0x170] sm:$0xff]  ;;  %v1878_v54 = vld [vmem:[%s1629_s20 + $0x178] sm:$0x3]  ;;  %v409_v6 = vrot.slane %v1872_v47, 1 }
  0x4f   : > { %2657 = vst [vmem:[#allocation13_spill] sm:$0xff] %v1875_v53  ;;  %v404_v9 = vrot.slane %v1875_v53, 1  ;;  %v406_v10 = vrot.slane %v1878_v54, 1 }
  0x55   : > { %470 = vrot.lane.b32.xlu2 %v395_v11, %s1586_s21  ;;  %v403_v11 = vrot.slane %v1881_v60, 1 }
  0x56   : > { %468 = vrot.lane.b32.xlu1 %v392_v13, %s1586_s21  ;;  %466 = vrot.lane.b32.xlu0 %v390_v16, %s1586_s21  ;;  %v410_v13 = vsel %vm327_vm0, %v408_v4, %v409_v6  ;;  %v407_v16 = vsel %vm327_vm0, %v404_v9, %v406_v10  ;;  %v413_v4 = vrot.slane %v1901_v34, 1 }
  0x57   : > { %v405_v31 = vsel %vm327_vm0, %v403_v11, %v404_v9 }
  0x5d   : > { %476 = vrot.lane.b32.xlu2 %v402_v43, %s1586_s21  ;;  %v1904_v43 = vld [vmem:[%s1629_s20 + $0x190] sm:$0x3] }
  0x5e   : > { %474 = vrot.lane.b32.xlu1 %v400_v44, %s1586_s21  ;;  %472 = vrot.lane.b32.xlu0 %v397_v45, %s1586_s21  ;;  %2659 = vst [vmem:[#allocation15_spill] sm:$0xff] %v1904_v43  ;;  %v414_v44 = vrot.slane %v1895_v32, 1  ;;  %v416_v45 = vrot.slane %v1898_v33, 1  ;;  %v411_v9 = vrot.slane %v1904_v43, 1  ;;  %v528_v43 = vrot.slane %v1650_v8, 2 }
  0x60   : > { %v417_v10 = vsel %vm327_vm0, %v414_v44, %v416_v45  ;;  %v415_v11 = vsel %vm327_vm0, %v413_v4, %v414_v44  ;;  %v412_v60 = vsel %vm327_vm0, %v409_v6, %v411_v9  ;;  %v530_v45 = vrot.slane %v1663_v15, 2 }
  0x61   : > { %v527_v44 = vrot.slane %v1647_v7, 2 }
  0x62   : > { %v531_v4 = vsel %vm526_vm1, %v528_v43, %v530_v45 }
  0x63   : > { %v529_v9 = vsel %vm526_vm1, %v527_v44, %v528_v43 }
  0x65   : > { %482 = vrot.lane.b32.xlu2 %v410_v13, %s1586_s21  ;;  %v532_v13 = vrot.slane %v1638_v2, 2 }
  0x66   : > { %480 = vrot.lane.b32.xlu1 %v407_v16, %s1586_s21  ;;  %478 = vrot.lane.b32.xlu0 %v405_v31, %s1586_s21  ;;  %v533_v16 = vrot.slane %v1643_v5, 2 }
  0x68   : > { %v534_v6 = vsel %vm526_vm1, %v532_v13, %v533_v16  ;;  %v535_v13 = vrot.slane %v1660_v14, 2  ;;  %v543_v14 = vrot.slane %v1683_v26, 2 }
  0x6a   : > { %v536_v44 = vsel %vm526_vm1, %v533_v16, %v535_v13  ;;  %v553_v13 = vrot.slane %v1703_v37, 2 }
  0x6d   : > { %488 = vrot.lane.b32.xlu2 %v417_v10, %s1586_s21  ;;  %v540_v10 = vrot.slane %v1656_v12, 2  ;;  %v547_v12 = vrot.slane %v1677_v24, 2 }
  0x6e   : > { %486 = vrot.lane.b32.xlu1 %v415_v11, %s1586_s21  ;;  %484 = vrot.lane.b32.xlu0 %v412_v60, %s1586_s21  ;;  %v538_v60 = vrot.slane %v1635_v1, 2  ;;  %v537_v11 = vrot.slane %v1632_v0, 2  ;;  %s218_s21 = scalar_lea.vmem %s2630_s4, %s1512_s13 }
  0x6f   : > { %v1921_v31 = vpop.permute.xlu2 %426 }
  0x70   : > { %v541_v45 = vsel %vm526_vm1, %v538_v60, %v540_v10  ;;  %v539_v43 = vsel %vm526_vm1, %v537_v11, %v538_v60  ;;  %v542_v60 = vrot.slane %v1689_v28, 2 }
  0x72   : > { %v544_v11 = vsel %vm526_vm1, %v542_v60, %v543_v14 }
  0x75   : > { %621 = vrot.lane.b32.xlu2 %v534_v6, %s1587_s22  ;;  %v548_v6 = vrot.slane %v1680_v25, 2 }
  0x76   : > { %619 = vrot.lane.b32.xlu1 %v531_v4, %s1587_s22  ;;  %617 = vrot.lane.b32.xlu0 %v529_v9, %s1587_s22  ;;  %v545_v9 = vrot.slane %v1686_v27, 2  ;;  %v552_v27 = vrot.slane %v1709_v39, 2 }
  0x77   : > { %v1934_v15 = vpop.permute.xlu2 %428  ;;  %v549_v16 = vsel %vm526_vm1, %v547_v12, %v548_v6 }
  0x78   : > { %v546_v10 = vsel %vm526_vm1, %v543_v14, %v545_v9  ;;  %v554_v60 = vsel %vm526_vm1, %v552_v27, %v553_v13 }
  0x7d   : > { %627 = vrot.lane.b32.xlu2 %v541_v45, %s1587_s22  ;;  %v555_v45 = vrot.slane %v1706_v38, 2  ;;  %v562_v38 = vrot.slane %v1725_v48, 2 }
  0x7e   : > { %625 = vrot.lane.b32.xlu1 %v539_v43, %s1587_s22  ;;  %623 = vrot.lane.b32.xlu0 %v536_v44, %s1587_s22  ;;  %v550_v44 = vrot.slane %v1712_v40, 2  ;;  %v563_v40 = vrot.slane %v1728_v49, 2  ;;  %v567_v49 = vrot.slane %v1757_v63, 2 }
  0x7f   : > { %v1946_v4 = vpop.permute.xlu2 %434  ;;  %v556_v14 = vsel %vm526_vm1, %v553_v13, %v555_v45  ;;  %v560_v45 = vrot.slane %v1734_v51, 2  ;;  %v557_v13 = vrot.slane %v1737_v52, 2  ;;  %v568_v51 = vrot.slane %v1751_v61, 2 }
  0x85   : > { %633 = vrot.lane.b32.xlu2 %v549_v16, %s1587_s22  ;;  %v551_v16 = vsel %vm526_vm1, %v548_v6, %v550_v44  ;;  %v564_v44 = vsel %vm526_vm1, %v562_v38, %v563_v40  ;;  %v565_v38 = vrot.slane %v1760_v3, 2  ;;  %v578_v3 = vrot.slane %v1776_v18, 2 }
  0x86   : > { %631 = vrot.lane.b32.xlu1 %v546_v10, %s1587_s22  ;;  %629 = vrot.lane.b32.xlu0 %v544_v11, %s1587_s22  ;;  %v558_v11 = vrot.slane %v1731_v50, 2 }
  0x87   : > { %v1959_v43 = vpop.permute.xlu2 %440 }
  0x88   : > { %v1963_v12 = vpop.permute.xlu1 %422  ;;  %v1965_v9 = vpop.permute.xlu0 %418 }
  0x8d   : > { %639 = vrot.lane.b32.xlu2 %v556_v14, %s1587_s22  ;;  %v561_v14 = vsel %vm526_vm1, %v558_v11, %v560_v45 }
  0x8e   : > { %637 = vrot.lane.b32.xlu1 %v554_v60, %s1587_s22  ;;  %635 = vrot.lane.b32.xlu0 %v551_v16, %s1587_s22  ;;  %v559_v60 = vsel %vm526_vm1, %v557_v13, %v558_v11  ;;  %v570_v16 = vrot.slane %v1754_v62, 2  ;;  %v569_v13 = vsel %vm526_vm1, %v567_v49, %v568_v51  ;;  %v577_v62 = vrot.slane %v1773_v17, 2 }
  0x8f   : > { %v1975_v10 = vpop.permute.xlu2 %446  ;;  %v572_v49 = vrot.slane %v1785_v21, 2 }
  0x90   : > { %v1980_v27 = vpop.permute.xlu1 %424  ;;  %v1982_v6 = vpop.permute.xlu0 %420  ;;  %v571_v11 = vsel %vm526_vm1, %v568_v51, %v570_v16  ;;  %v575_v16 = vrot.slane %v1782_v20, 2  ;;  %v583_v20 = vrot.slane %v1799_v35, 2 }
  0x95   : > { %645 = vrot.lane.b32.xlu2 %v564_v44, %s1587_s22  ;;  %v566_v44 = vsel %vm526_vm1, %v563_v40, %v565_v38  ;;  %v579_v38 = vsel %vm526_vm1, %v577_v62, %v578_v3  ;;  %v580_v62 = vrot.slane %v1808_v42, 2  ;;  %v593_v42 = vrot.slane %v1824_v56, 2 }
  0x96   : > { %643 = vrot.lane.b32.xlu1 %v561_v14, %s1587_s22  ;;  %641 = vrot.lane.b32.xlu0 %v559_v60, %s1587_s22  ;;  %v573_v60 = vrot.slane %v1779_v19, 2  ;;  %v582_v19 = vrot.slane %v1805_v41, 2  ;;  %v597_v56 = vrot.slane %v1853_v29, 2 }
  0x97   : > { %v1992_v52 = vpop.permute.xlu2 %452 }
  0x98   : > { %v1996_v50 = vpop.permute.xlu1 %432  ;;  %v1998_v45 = vpop.permute.xlu0 %430 }
  0x9d   : > { %651 = vrot.lane.b32.xlu2 %v571_v11, %s1587_s22  ;;  %v576_v11 = vsel %vm526_vm1, %v573_v60, %v575_v16 }
  0x9e   : > { %649 = vrot.lane.b32.xlu1 %v569_v13, %s1587_s22  ;;  %647 = vrot.lane.b32.xlu0 %v566_v44, %s1587_s22  ;;  %v574_v13 = vsel %vm526_vm1, %v572_v49, %v573_v60  ;;  %v585_v44 = vrot.slane %v1802_v36, 2  ;;  %v584_v49 = vsel %vm526_vm1, %v582_v19, %v583_v20  ;;  %v592_v36 = vrot.slane %v1821_v55, 2 }
  0x9f   : > { %v2008_v14 = vpop.permute.xlu2 %458  ;;  %v587_v19 = vrot.slane %v1833_v59, 2 }
  0xa0   : > { %v2013_v51 = vpop.permute.xlu1 %438  ;;  %v2015_v40 = vpop.permute.xlu0 %436  ;;  %v586_v60 = vsel %vm526_vm1, %v583_v20, %v585_v44  ;;  %v590_v44 = vrot.slane %v1830_v58, 2  ;;  %v598_v58 = vrot.slane %v1847_v22, 2  ;;  %v2661_v22 = vld [vmem:[#allocation14_spill] sm:$0xff] }
  0xa5   : > { %657 = vrot.lane.b32.xlu2 %v579_v38, %s1587_s22  ;;  %v581_v38 = vsel %vm526_vm1, %v578_v3, %v580_v62  ;;  %v594_v62 = vsel %vm526_vm1, %v592_v36, %v593_v42  ;;  %v595_v36 = vrot.slane %v1856_v30, 2  ;;  %v608_v30 = vrot.slane %v1872_v47, 2 }
  0xa6   : > { %655 = vrot.lane.b32.xlu1 %v576_v11, %s1587_s22  ;;  %653 = vrot.lane.b32.xlu0 %v574_v13, %s1587_s22  ;;  %v588_v13 = vrot.slane %v1827_v57, 2 }
  0xa7   : > { %v2025_v18 = vpop.permute.xlu2 %464 }
  0xa8   : > { %v2029_v21 = vpop.permute.xlu1 %444  ;;  %v2031_v16 = vpop.permute.xlu0 %442 }
  0xad   : > { %663 = vrot.lane.b32.xlu2 %v586_v60, %s1587_s22  ;;  %v591_v60 = vsel %vm526_vm1, %v588_v13, %v590_v44 }
  0xae   : > { %661 = vrot.lane.b32.xlu1 %v584_v49, %s1587_s22  ;;  %659 = vrot.lane.b32.xlu0 %v581_v38, %s1587_s22  ;;  %v589_v49 = vsel %vm526_vm1, %v587_v19, %v588_v13  ;;  %v600_v38 = vrot.slane %v1850_v23, 2  ;;  %v599_v19 = vsel %vm526_vm1, %v597_v56, %v598_v58  ;;  %v607_v23 = vrot.slane %v1869_v46, 2 }
  0xaf   : > { %v2041_v11 = vpop.permute.xlu2 %470  ;;  %v602_v56 = vrot.slane %v2661_v22, 2  ;;  %v612_v22 = vrot.slane %v1901_v34, 2 }
  0xb0   : > { %v2046_v20 = vpop.permute.xlu1 %450  ;;  %v2048_v3 = vpop.permute.xlu0 %448  ;;  %v601_v13 = vsel %vm526_vm1, %v598_v58, %v600_v38  ;;  %v605_v38 = vrot.slane %v1878_v54, 2  ;;  %v613_v54 = vrot.slane %v1895_v32, 2 }
  0xb5   : > { %669 = vrot.lane.b32.xlu2 %v594_v62, %s1587_s22  ;;  %v596_v62 = vsel %vm526_vm1, %v593_v42, %v595_v36  ;;  %v609_v36 = vsel %vm526_vm1, %v607_v23, %v608_v30 }
  0xb6   : > { %667 = vrot.lane.b32.xlu1 %v591_v60, %s1587_s22  ;;  %665 = vrot.lane.b32.xlu0 %v589_v49, %s1587_s22  ;;  %v603_v49 = vrot.slane %v1875_v53, 2  ;;  %v2662_v53 = vld [vmem:[#allocation15_spill] sm:$0xff] }
  0xb7   : > { %v2058_v57 = vpop.permute.xlu2 %476  ;;  %v610_v23 = vrot.slane %v2662_v53, 2 }
  0xb8   : > { %2660 = vst [vmem:[#allocation16_spill] sm:$0xff] %v2058_v57  ;;  %v2062_v55 = vpop.permute.xlu1 %456  ;;  %v2064_v44 = vpop.permute.xlu0 %454 }
  0xbd   : > { %675 = vrot.lane.b32.xlu2 %v601_v13, %s1587_s22  ;;  %v606_v13 = vsel %vm526_vm1, %v603_v49, %v605_v38 }
  0xbe   : > { %673 = vrot.lane.b32.xlu1 %v599_v19, %s1587_s22  ;;  %671 = vrot.lane.b32.xlu0 %v596_v62, %s1587_s22  ;;  %v604_v19 = vsel %vm526_vm1, %v602_v56, %v603_v49  ;;  %v615_v62 = vrot.slane %v1898_v33, 2  ;;  %v614_v56 = vsel %vm526_vm1, %v612_v22, %v613_v54 }
  0xbf   : > { %v2074_v60 = vpop.permute.xlu2 %482 }
  0xc0   : > { %v2079_v58 = vpop.permute.xlu1 %462  ;;  %v2081_v42 = vpop.permute.xlu0 %460  ;;  %v616_v49 = vsel %vm526_vm1, %v613_v54, %v615_v62 }
  0xc5   : > { %681 = vrot.lane.b32.xlu2 %v609_v36, %s1587_s22  ;;  %v611_v36 = vsel %vm526_vm1, %v608_v30, %v610_v23  ;;  %v731_v23 = vsel %vm725_vm3, %v1635_v1, %v1934_v15  ;;  %v737_v1 = vsel %vm725_vm3, %v1703_v37, %v1959_v43  ;;  %v740_v37 = vsel %vm725_vm3, %v1725_v48, %v1975_v10 }
  0xc6   : > { %679 = vrot.lane.b32.xlu1 %v606_v13, %s1587_s22  ;;  %677 = vrot.lane.b32.xlu0 %v604_v19, %s1587_s22  ;;  %v728_v19 = vsel %vm725_vm3, %v1638_v2, %v1963_v12  ;;  %v729_v43 = vsel %vm725_vm3, %v1643_v5, %v1980_v27  ;;  %v733_v48 = vsel %vm725_vm3, %v1683_v26, %v1996_v50 }
  0xc7   : > { %v2091_v47 = vpop.permute.xlu2 %488  ;;  %v735_v50 = vsel %vm725_vm3, %v1680_v25, %v2015_v40  ;;  %v2663_v25 = vld [vmem:[#allocation3_spill] sm:$0xff] }
  0xc8   : > { %v2095_v57 = vpop.permute.xlu1 %468  ;;  %v2097_v38 = vpop.permute.xlu0 %466 }
  0xcd   : > { %687 = vrot.lane.b32.xlu2 %v616_v49, %s1587_s22 }
  0xce   : > { %685 = vrot.lane.b32.xlu1 %v614_v56, %s1587_s22  ;;  %683 = vrot.lane.b32.xlu0 %v611_v36, %s1587_s22  ;;  %v734_v36 = vsel %vm725_vm3, %v1677_v24, %v1946_v4 }
  0xcf   : > { %v622_v33 = vpop.permute.xlu2 %621 }
  0xd0   : > { %v2105_v13 = vpop.permute.xlu1 %474  ;;  %v2107_v53 = vpop.permute.xlu0 %472  ;;  %v2113_v22 = vsel %vm762_vm2, %v728_v19, %v622_v33  ;;  %v726_v19 = vsel %vm725_vm3, %v1647_v7, %v1965_v9 }
  0xd6   : > { %831 = vrot.lane.b32.xlu0 %v2113_v22, %s1588_s23 }
  0xd7   : > { %v628_v30 = vpop.permute.xlu2 %627 }
  0xd8   : > { %v2117_v54 = vpop.permute.xlu1 %480  ;;  %v2119_v62 = vpop.permute.xlu0 %478  ;;  %v2125_v49 = vsel %vm762_vm2, %v731_v23, %v628_v30  ;;  %v727_v30 = vsel %vm725_vm3, %v1650_v8, %v1982_v6  ;;  %v730_v8 = vsel %vm725_vm3, %v1632_v0, %v1921_v31  ;;  %v743_v0 = vsel %vm725_vm3, %v1751_v61, %v1992_v52 }
  0xd9   : > { %v732_v31 = vsel %vm725_vm3, %v1689_v28, %v1998_v45  ;;  %v736_v28 = vsel %vm725_vm3, %v1709_v39, %v2013_v51  ;;  %v746_v39 = vsel %vm725_vm3, %v1773_v17, %v2008_v14  ;;  %v739_v51 = vsel %vm725_vm3, %v2663_v25, %v2029_v21  ;;  %v2664_v14 = vld [vmem:[#allocation2_spill] sm:$0xff] }
  0xda   : > { %v742_v21 = vsel %vm725_vm3, %v1757_v63, %v2046_v20 }
  0xde   : > { %837 = vrot.lane.b32.xlu0 %v2125_v49, %s1588_s23 }
  0xdf   : > { %v634_v2 = vpop.permute.xlu2 %633 }
  0xe0   : > { %v2129_v12 = vpop.permute.xlu1 %486  ;;  %v2131_v56 = vpop.permute.xlu0 %484  ;;  %v2137_v33 = vsel %vm762_vm2, %v734_v36, %v634_v2 }
  0xe6   : > { %843 = vrot.lane.b32.xlu0 %v2137_v33, %s1588_s23 }
  0xe7   : > { %v640_v15 = vpop.permute.xlu2 %639 }
  0xe8   : > { %v620_v24 = vpop.permute.xlu1 %619  ;;  %v618_v4 = vpop.permute.xlu0 %617  ;;  %v2151_v23 = vsel %vm762_vm2, %v737_v1, %v640_v15 }
  0xe9   : > { %v2154_v2 = vsel %vm762_vm2, %v727_v30, %v620_v24  ;;  %v2157_v36 = vsel %vm762_vm2, %v726_v19, %v618_v4 }
  0xef   : > { %v646_v7 = vpop.permute.xlu2 %645 }
  0xf0   : > { %v626_v9 = vpop.permute.xlu1 %625  ;;  %v624_v6 = vpop.permute.xlu0 %623  ;;  %v2169_v1 = vsel %vm762_vm2, %v740_v37, %v646_v7 }
  0xf1   : > { %v2172_v15 = vsel %vm762_vm2, %v730_v8, %v626_v9  ;;  %v2175_v19 = vsel %vm762_vm2, %v729_v43, %v624_v6  ;;  %v741_v6 = vsel %vm725_vm3, %v2664_v14, %v2048_v3 }
  0xf2   : > { %835 = vrot.lane.b32.xlu2 %v2172_v15, %s1588_s23  ;;  %833 = vrot.lane.b32.xlu1 %v2175_v19, %s1588_s23 }
  0xf7   : > { %v652_v5 = vpop.permute.xlu2 %651 }
  0xf8   : > { %v632_v10 = vpop.permute.xlu1 %631  ;;  %v630_v27 = vpop.permute.xlu0 %629  ;;  %v2191_v30 = vsel %vm762_vm2, %v743_v0, %v652_v5 }
  0xf9   : > { %v2194_v24 = vsel %vm762_vm2, %v733_v48, %v632_v10  ;;  %v2197_v4 = vsel %vm762_vm2, %v732_v31, %v630_v27  ;;  %v2665_v27 = vld [vmem:[#allocation7_spill] sm:$0xff] }
  0xfa   : > { %841 = vrot.lane.b32.xlu2 %v2194_v24, %s1588_s23  ;;  %839 = vrot.lane.b32.xlu1 %v2197_v4, %s1588_s23  ;;  %v744_v63 = vsel %vm725_vm3, %v2665_v27, %v2064_v44  ;;  %v749_v44 = vsel %vm725_vm3, %v1799_v35, %v2025_v18 }
  0xff   : > { %v658_v26 = vpop.permute.xlu2 %657 }
 0x100   : > { %v638_v52 = vpop.permute.xlu1 %637  ;;  %v636_v61 = vpop.permute.xlu0 %635  ;;  %v2226_v43 = vsel %vm762_vm2, %v746_v39, %v658_v26  ;;  %v2667_v39 = vld [vmem:[#allocation5_spill] sm:$0xff] }
 0x101   : > { %v2210_v45 = vsel %vm762_vm2, %v736_v28, %v638_v52  ;;  %v2213_v37 = vsel %vm762_vm2, %v735_v50, %v636_v61  ;;  %v758_v28 = vsel %vm725_vm3, %v1869_v46, %v2074_v60  ;;  %v2666_v52 = vld [vmem:[#allocation6_spill] sm:$0xff]  ;;  %v747_v25 = vsel %vm725_vm3, %v2667_v39, %v2081_v42  ;;  %v2668_v42 = vld [vmem:[#allocation4_spill] sm:$0xff] }
 0x102   : > { %847 = vrot.lane.b32.xlu2 %v2210_v45, %s1588_s23  ;;  %845 = vrot.lane.b32.xlu1 %v2213_v37, %s1588_s23  ;;  %v745_v61 = vsel %vm725_vm3, %v2666_v52, %v2062_v55  ;;  %v761_v55 = vsel %vm725_vm3, %v1895_v32, %v2091_v47  ;;  %v2672_v52 = vld [vmem:[#allocation11_spill] sm:$0xff] }
 0x107   : > { %v664_v7 = vpop.permute.xlu2 %663 }
 0x108   : > { %v644_v40 = vpop.permute.xlu1 %643  ;;  %v642_v8 = vpop.permute.xlu0 %641 }
 0x109   : > { %v2229_v9 = vsel %vm762_vm2, %v739_v51, %v644_v40 }
 0x10a   : > { %929 = vrot.lane.b32.xlu2 %v2172_v15, %s1589_s24  ;;  %961 = vrot.lane.b32.xlu1 %v2226_v43, %s1589_s24 }
 0x10f   : > { %v670_v17 = vpop.permute.xlu2 %669 }
 0x110   : > { %v650_v0 = vpop.permute.xlu1 %649  ;;  %v648_v5 = vpop.permute.xlu0 %647 }
 0x111   : > { %v2242_v48 = vsel %vm762_vm2, %v741_v6, %v648_v5  ;;  %v2245_v31 = vsel %vm762_vm2, %v742_v21, %v650_v0  ;;  %v2277_v21 = vsel %vm762_vm2, %v749_v44, %v664_v7  ;;  %v738_v7 = vsel %vm725_vm3, %v2668_v42, %v2031_v16  ;;  %v2671_v44 = vld [vmem:[#allocation16_spill] sm:$0xff] }
 0x112   : > { %931 = vrot.lane.b32.xlu2 %v2125_v49, %s1589_s24  ;;  %v748_v6 = vsel %vm725_vm3, %v1805_v41, %v2079_v58  ;;  %v2304_v0 = vsel %vm762_vm2, %v738_v7, %v642_v8  ;;  %v750_v41 = vsel %vm725_vm3, %v1833_v59, %v2097_v38  ;;  %v2669_v58 = vld [vmem:[#allocation8_spill] sm:$0xff]  ;;  %v2674_v7 = vld [vmem:[#allocation13_spill] sm:$0xff] }
 0x113   : > { %v752_v8 = vsel %vm725_vm3, %v2669_v58, %v2041_v11  ;;  %v754_v11 = vsel %vm725_vm3, %v1853_v29, %v2105_v13  ;;  %v1094_v29 = vld [vmem:[%s2627_s1 + $0x18] sm:$0xff] }
 0x114   : > { %v2329_v27 = vsel %vm762_vm2, %v752_v8, %v670_v17  ;;  %v1095_v17 = vld [vmem:[%s2627_s1 + $0x20] sm:$0xf] }
 0x115   : > { %1514 = vmatpush.msk.msra.mxu0 %vm1193_vm4, %v1095_v17  ;;  %1550 = vmatpush.msk.msra.mxu1 %vm1193_vm4, %v1095_v17 }
 0x116   : > { %1551 = vmatpush.msk.msra.mxu2 %vm1193_vm4, %v1095_v17  ;;  %1552 = vmatpush.msk.msra.mxu3 %vm1193_vm4, %v1095_v17 }
 0x117   : > { %v2249_v10 = vpop.permute.xlu2 %675  ;;  %1209 = vmatpush.msra.mxu0 %v1094_v29  ;;  %1553 = vmatpush.msra.mxu1 %v1094_v29 }
 0x118   : > { %v656_v20 = vpop.permute.xlu1 %655  ;;  %v654_v26 = vpop.permute.xlu0 %653  ;;  %1554 = vmatpush.msra.mxu2 %v1094_v29  ;;  %1555 = vmatpush.msra.mxu3 %v1094_v29 }
 0x119   : > { %v2255_v3 = vsel %vm762_vm2, %v744_v63, %v654_v26  ;;  %v2280_v46 = vsel %vm762_vm2, %v745_v61, %v656_v20  ;;  %v1093_v63 = vld [vmem:[%s2627_s1 + $0x10] sm:$0xff]  ;;  %v2670_v20 = vld [vmem:[#allocation9_spill] sm:$0xff]  ;;  %v755_v61 = vsel %vm725_vm3, %v2672_v52, %v2671_v44 }
 0x11a   : > { %933 = vrot.lane.b32.xlu2 %v2197_v4, %s1589_s24  ;;  %863 = vrot.lane.b32.xlu0 %v2255_v3, %s1588_s23  ;;  %v753_v26 = vsel %vm725_vm3, %v2670_v20, %v2107_v53  ;;  %v1091_v53 = vld [vmem:[%s2627_s1] sm:$0xff]  ;;  %v2379_v39 = vsel %vm762_vm2, %v755_v61, %v2249_v10 }
 0x11b   : > { %1210 = vmatpush.msra.mxu0 %v1093_v63  ;;  %1556 = vmatpush.msra.mxu1 %v1093_v63 }
 0x11c   : > { %1557 = vmatpush.msra.mxu2 %v1093_v63  ;;  %1558 = vmatpush.msra.mxu3 %v1093_v63 }
 0x11f   : > { %v682_v50 = vpop.permute.xlu2 %681 }
 0x120   : > { %v660_v51 = vpop.permute.xlu0 %659  ;;  %v2274_v40 = vsel %vm762_vm2, %v758_v28, %v682_v50  ;;  %v662_v35 = vpop.permute.xlu1 %661  ;;  %v1092_v50 = vld [vmem:[%s2627_s1 + $0x8] sm:$0xff] }
 0x121   : > { %v2283_v18 = vsel %vm762_vm2, %v747_v25, %v660_v51  ;;  %v2311_v47 = vsel %vm762_vm2, %v748_v6, %v662_v35  ;;  %1211 = vmatpush.msra.mxu0 %v1092_v50  ;;  %1559 = vmatpush.msra.mxu1 %v1092_v50  ;;  %v757_v6 = vsel %vm725_vm3, %v2674_v7, %v2117_v54 }
 0x122   : > { %967 = vrot.lane.b32.xlu2 %v2277_v21, %s1589_s24  ;;  %865 = vrot.lane.b32.xlu0 %v2280_v46, %s1588_s23 }
 0x123   : > { %963 = vrot.lane.b32.xlu1 %v2283_v18, %s1589_s24  ;;  %1560 = vmatpush.msra.mxu2 %v1092_v50 }
 0x124   : > { %1212 = vmatpush.msra.mxu0 %v1091_v53  ;;  %1561 = vmatpush.msra.mxu3 %v1092_v50  ;;  %v2676_v50 = vld [vmem:[#allocation12_spill] sm:$0xff] }
 0x125   : > { %1562 = vmatpush.msra.mxu1 %v1091_v53  ;;  %1563 = vmatpush.msra.mxu2 %v1091_v53 }
 0x126   : > { %1564 = vmatpush.msra.mxu3 %v1091_v53  ;;  %v759_v53 = vsel %vm725_vm3, %v2676_v50, %v2131_v56 }
 0x127   : > { %v688_v60 = vpop.permute.xlu2 %687 }
 0x128   : > { %v2298_v14 = vsel %vm762_vm2, %v761_v55, %v688_v60  ;;  %v2315_v32 = vpop.permute.xlu1 %667  ;;  %v666_v16 = vpop.permute.xlu0 %665  ;;  %v2673_v60 = vld [vmem:[#allocation10_spill] sm:$0xff] }
 0x129   : > { %v2324_v5 = vsel %vm762_vm2, %v750_v41, %v666_v16  ;;  %v751_v42 = vsel %vm725_vm3, %v2673_v60, %v2095_v57  ;;  %v2675_v16 = vld [vmem:[#allocation14_spill] sm:$0xff] }
 0x12a   : > { %945 = vrot.lane.b32.xlu2 %v2304_v0, %s1589_s24  ;;  %867 = vrot.lane.b32.xlu0 %v2226_v43, %s1588_s23  ;;  %v756_v41 = vsel %vm725_vm3, %v2675_v16, %v2119_v62  ;;  %v2406_v58 = vsel %vm762_vm2, %v751_v42, %v2315_v32 }
 0x12b   : > { %965 = vrot.lane.b32.xlu1 %v2311_v47, %s1589_s24 }
 0x130   : > { %v674_v59 = vpop.permute.xlu1 %673  ;;  %v672_v13 = vpop.permute.xlu0 %671 }
 0x131   : > { %v2339_v38 = vsel %vm762_vm2, %v754_v11, %v674_v59  ;;  %v2364_v28 = vsel %vm762_vm2, %v753_v26, %v672_v13 }
 0x132   : > { %869 = vrot.lane.b32.xlu0 %v2283_v18, %s1588_s23  ;;  %969 = vrot.lane.b32.xlu2 %v2324_v5, %s1589_s24 }
 0x133   : > { %879 = vrot.lane.b32.xlu1 %v2329_v27, %s1588_s23 }
 0x138   : > { %v678_v51 = vpop.permute.xlu0 %677  ;;  %v680_v35 = vpop.permute.xlu1 %679 }
 0x139   : > { %v2409_v8 = vsel %vm762_vm2, %v757_v6, %v680_v35  ;;  %v2416_v57 = vsel %vm762_vm2, %v756_v41, %v678_v51 }
 0x13a   : > { %977 = vrot.lane.b32.xlu0 %v2339_v38, %s1589_s24  ;;  %937 = vrot.lane.b32.xlu2 %v2137_v33, %s1589_s24 }
 0x13b   : > { %935 = vrot.lane.b32.xlu1 %v2194_v24, %s1589_s24 }
 0x140   : > { %v684_v55 = vpop.permute.xlu0 %683  ;;  %v686_v62 = vpop.permute.xlu1 %685 }
 0x141   : > { %v796_v52 = vsel %vm762_vm2, %v759_v53, %v684_v55 }
 0x142   : > { %871 = vrot.lane.b32.xlu0 %v2311_v47, %s1588_s23  ;;  %883 = vrot.lane.b32.xlu2 %v2339_v38, %s1588_s23 }
 0x143   : > { %881 = vrot.lane.b32.xlu1 %v2364_v28, %s1588_s23 }
 0x148   : > { %v832_v32 = vpop.permute.xlu0 %831 }
 0x149   : > { %v1026_v59 = vsel %vm1025_vm5, %v2157_v36, %v832_v32 }
 0x14a   : > { %979 = vrot.lane.b32.xlu0 %v2379_v39, %s1589_s24  ;;  %851 = vrot.lane.b32.xlu2 %v2304_v0, %s1588_s23 }
 0x14b   : > { %849 = vrot.lane.b32.xlu1 %v2151_v23, %s1588_s23 }
 0x14c   : > { %v836_v25 = vpop.permute.xlu2 %835 }
 0x14d   : > { %v1028_v20 = vsel %vm1025_vm5, %v2113_v22, %v836_v25 }
 0x150   : > { %v838_v61 = vpop.permute.xlu0 %837 }
 0x152   : > { %947 = vrot.lane.b32.xlu0 %v2229_v9, %s1589_s24  ;;  %875 = vrot.lane.b32.xlu2 %v2324_v5, %s1588_s23 }
 0x153   : > { %873 = vrot.lane.b32.xlu1 %v2277_v21, %s1588_s23 }
 0x154   : > { %v2393_v10 = vpop.permute.xlu2 %841 }
 0x158   : > { %v2467_v25 = vpop.permute.xlu0 %843 }
 0x15a   : > { %971 = vrot.lane.b32.xlu0 %v2406_v58, %s1589_s24  ;;  %983 = vrot.lane.b32.xlu2 %v2409_v8, %s1589_s24 }
 0x15b   : > { %981 = vrot.lane.b32.xlu1 %v2416_v57, %s1589_s24 }
 0x15c   : > { %v848_v54 = vpop.permute.xlu2 %847 }
 0x15d   : > { %v1034_v51 = vsel %vm1025_vm5, %v2137_v33, %v848_v54  ;;  %v760_v54 = vsel %vm725_vm3, %v1901_v34, %v2129_v12 }
 0x15e   : > { %v797_v32 = vsel %vm762_vm2, %v760_v54, %v686_v62 }
 0x162   : > { %939 = vrot.lane.b32.xlu0 %v2213_v37, %s1589_s24  ;;  %951 = vrot.lane.b32.xlu2 %v2242_v48, %s1589_s24 }
 0x163   : > { %949 = vrot.lane.b32.xlu1 %v2169_v1, %s1589_s24 }
 0x164   : > { %v930_v11 = vpop.permute.xlu2 %929  ;;  %v834_v29 = vpop.permute.xlu1 %833 }
 0x165   : > { %v1059_v17 = vsel %vm1058_vm6, %v1026_v59, %v930_v11  ;;  %v1027_v13 = vsel %vm1025_vm5, %v2154_v2, %v834_v29 }
 0x166   : > { %1515 = vmatmul.msk.f32.vlgmr.msra.gmra.mxu0 %vm1096_vm7, %v1059_v17 }
 0x16a   : > { %885 = vrot.lane.b32.xlu0 %v2379_v39, %s1588_s23  ;;  %975 = vrot.lane.b32.xlu2 %v2364_v28, %s1589_s24 }
 0x16b   : > { %973 = vrot.lane.b32.xlu1 %v2329_v27, %s1589_s24 }
 0x16c   : > { %v932_v63 = vpop.permute.xlu2 %931  ;;  %v840_v44 = vpop.permute.xlu1 %839 }
 0x16d   : > { %v1060_v36 = vsel %vm1058_vm6, %v1027_v13, %v932_v63 }
 0x16e   : > { %1516 = vmatmul.msk.f32.gmra.mxu0 %vm1096_vm7, %v1060_v36 }
 0x172   : > { %853 = vrot.lane.b32.xlu0 %v2229_v9, %s1588_s23  ;;  %943 = vrot.lane.b32.xlu2 %v2151_v23, %s1589_s24 }
 0x173   : > { %941 = vrot.lane.b32.xlu1 %v2210_v45, %s1589_s24 }
 0x174   : > { %v934_v26 = vpop.permute.xlu2 %933  ;;  %v2463_v56 = vpop.permute.xlu1 %845 }
 0x175   : > { %v1061_v2 = vsel %vm1058_vm6, %v1028_v20, %v934_v26 }
 0x176   : > { %1517 = vmatmul.msk.f32.gmra.mxu0 %vm1096_vm7, %v1061_v2 }
 0x17a   : > { %877 = vrot.lane.b32.xlu0 %v2406_v58, %s1588_s23  ;;  %987 = vrot.lane.b32.xlu2 %v796_v52, %s1589_s24 }
 0x17b   : > { %887 = vrot.lane.b32.xlu1 %v2416_v57, %s1588_s23 }
 0x17c   : > { %v968_v22 = vpop.permute.xlu2 %967  ;;  %v962_v60 = vpop.permute.xlu1 %961 }
 0x182   : > { %985 = vrot.lane.b32.xlu0 %v2274_v40, %s1589_s24  ;;  %891 = vrot.lane.b32.xlu2 %v2274_v40, %s1588_s23 }
 0x183   : > { %855 = vrot.lane.b32.xlu1 %v2169_v1, %s1588_s23 }
 0x184   : > { %v946_v35 = vpop.permute.xlu2 %945 }
 0x185   : > { %v1067_v55 = vsel %vm1058_vm6, %v1034_v51, %v946_v35 }
 0x186   : > { %1523 = vmatmul.msk.f32.vlgmr.msra.gmra.mxu1 %vm1096_vm7, %v1067_v55 }
 0x18a   : > { %953 = vrot.lane.b32.xlu0 %v2245_v31, %s1589_s24  ;;  %957 = vrot.lane.b32.xlu2 %v2255_v3, %s1589_s24 }
 0x18b   : > { %889 = vrot.lane.b32.xlu1 %v2409_v8, %s1588_s23 }
 0x18c   : > { %v864_v40 = vpop.permute.xlu0 %863  ;;  %v970_v59 = vpop.permute.xlu2 %969 }
 0x18d   : > { %v1042_v42 = vsel %vm1025_vm5, %v2245_v31, %v864_v40 }
 0x18e   : > { %v1075_v33 = vsel %vm1058_vm6, %v1042_v42, %v962_v60 }
 0x18f   : > { %1531 = vmatmul.msk.f32.vlgmr.msra.gmra.mxu2 %vm1096_vm7, %v1075_v33 }
 0x192   : > { %857 = vrot.lane.b32.xlu0 %v2242_v48, %s1588_s23  ;;  %861 = vrot.lane.b32.xlu2 %v2191_v30, %s1588_s23 }
 0x193   : > { %955 = vrot.lane.b32.xlu1 %v2191_v30, %s1589_s24 }
 0x194   : > { %v866_v7 = vpop.permute.xlu0 %865  ;;  %v938_v12 = vpop.permute.xlu2 %937 }
 0x195   : > { %v964_v6 = vpop.permute.xlu1 %963  ;;  %v1043_v16 = vsel %vm1025_vm5, %v2191_v30, %v866_v7 }
 0x196   : > { %v1076_v41 = vsel %vm1058_vm6, %v1043_v16, %v964_v6 }
 0x197   : > { %1532 = vmatmul.msk.f32.gmra.mxu2 %vm1096_vm7, %v1076_v41  ;;  %v1031_v41 = vsel %vm1025_vm5, %v2125_v49, %v2393_v10 }
 0x19a   : > { %989 = vrot.lane.b32.xlu0 %v797_v32, %s1589_s24 }
 0x19b   : > { %859 = vrot.lane.b32.xlu1 %v2245_v31, %s1588_s23 }
 0x19c   : > { %v868_v11 = vpop.permute.xlu0 %867  ;;  %v884_v2 = vpop.permute.xlu2 %883 }
 0x19d   : > { %v966_v17 = vpop.permute.xlu1 %965  ;;  %v1044_v30 = vsel %vm1025_vm5, %v2255_v3, %v868_v11  ;;  %v1052_v33 = vsel %vm1025_vm5, %v2329_v27, %v884_v2 }
 0x19e   : > { %v1077_v29 = vsel %vm1058_vm6, %v1044_v30, %v966_v17 }
 0x19f   : > { %1533 = vmatmul.msk.f32.gmra.mxu2 %vm1096_vm7, %v1077_v29 }
 0x1a2   : > { %893 = vrot.lane.b32.xlu0 %v796_v52, %s1588_s23 }
 0x1a3   : > { %991 = vrot.lane.b32.xlu1 %v2298_v14, %s1589_s24  ;;  %v1029_v14 = vsel %vm1025_vm5, %v2175_v19, %v838_v61 }
 0x1a4   : > { %v870_v34 = vpop.permute.xlu0 %869  ;;  %v852_v61 = vpop.permute.xlu2 %851 }
 0x1a5   : > { %v880_v62 = vpop.permute.xlu1 %879  ;;  %v1045_v31 = vsel %vm1025_vm5, %v2280_v46, %v870_v34 }
 0x1a6   : > { %v1078_v13 = vsel %vm1058_vm6, %v1045_v31, %v968_v22  ;;  %v1050_v3 = vsel %vm1025_vm5, %v2324_v5, %v880_v62 }
 0x1a7   : > { %1534 = vmatmul.msk.f32.gmra.mxu2 %vm1096_vm7, %v1078_v13 }
 0x1aa   : > { %959 = vrot.lane.b32.xlu0 %v2280_v46, %s1589_s24  ;;  %v1030_v46 = vsel %vm1025_vm5, %v2172_v15, %v840_v44 }
 0x1ab   : > { %v1063_v19 = vsel %vm1058_vm6, %v1030_v46, %v938_v12 }
 0x1ac   : > { %v978_v63 = vpop.permute.xlu0 %977  ;;  %v876_v44 = vpop.permute.xlu2 %875 }
 0x1ad   : > { %v936_v36 = vpop.permute.xlu1 %935  ;;  %v1083_v20 = vsel %vm1058_vm6, %v1050_v3, %v978_v63  ;;  %v1048_v30 = vsel %vm1025_vm5, %v2311_v47, %v876_v44  ;;  %v1032_v47 = vsel %vm1025_vm5, %v2197_v4, %v2467_v25  ;;  %v1033_v4 = vsel %vm1025_vm5, %v2194_v24, %v2463_v56 }
 0x1ae   : > { %v1062_v26 = vsel %vm1058_vm6, %v1029_v14, %v936_v36  ;;  %1539 = vmatmul.msk.f32.vlgmr.msra.gmra.mxu3 %vm1096_vm7, %v1083_v20 }
 0x1af   : > { %1518 = vmatmul.msk.f32.gmra.mxu0 %vm1096_vm7, %v1062_v26 }
 0x1b4   : > { %v872_v50 = vpop.permute.xlu0 %871  ;;  %v984_v7 = vpop.permute.xlu2 %983 }
 0x1b5   : > { %v882_v53 = vpop.permute.xlu1 %881  ;;  %v1046_v5 = vsel %vm1025_vm5, %v2226_v43, %v872_v50 }
 0x1b6   : > { %v1079_v52 = vsel %vm1058_vm6, %v1046_v5, %v970_v59  ;;  %v1051_v22 = vsel %vm1025_vm5, %v2406_v58, %v882_v53 }
 0x1b7   : > { %1519 = vmatmul.msk.f32.gmra.mxu0 %vm1096_vm7, %v1063_v19  ;;  %1535 = vmatmul.msk.f32.gmra.mxu2 %vm1096_vm7, %v1079_v52 }
 0x1bc   : > { %v980_v51 = vpop.permute.xlu0 %979  ;;  %v952_v11 = vpop.permute.xlu2 %951 }
 0x1bd   : > { %v850_v35 = vpop.permute.xlu1 %849  ;;  %v1084_v15 = vsel %vm1058_vm6, %v1051_v22, %v980_v51 }
 0x1be   : > { %1540 = vmatmul.msk.f32.gmra.mxu3 %vm1096_vm7, %v1084_v15  ;;  %v1035_v43 = vsel %vm1025_vm5, %v2213_v37, %v850_v35 }
 0x1c4   : > { %v948_v55 = vpop.permute.xlu0 %947  ;;  %v976_v34 = vpop.permute.xlu2 %975 }
 0x1c5   : > { %v874_v40 = vpop.permute.xlu1 %873  ;;  %v1068_v60 = vsel %vm1058_vm6, %v1035_v43, %v948_v55 }
 0x1c6   : > { %1524 = vmatmul.msk.f32.gmra.mxu1 %vm1096_vm7, %v1068_v60  ;;  %v1047_v42 = vsel %vm1025_vm5, %v2283_v18, %v874_v40  ;;  %v1036_v18 = vsel %vm1025_vm5, %v2210_v45, %v852_v61 }
 0x1cc   : > { %v972_v58 = vpop.permute.xlu0 %971  ;;  %v944_v63 = vpop.permute.xlu2 %943 }
 0x1cd   : > { %v982_v6 = vpop.permute.xlu1 %981  ;;  %v1080_v16 = vsel %vm1058_vm6, %v1047_v42, %v972_v58  ;;  %v1066_v20 = vsel %vm1058_vm6, %v1033_v4, %v944_v63 }
 0x1ce   : > { %1536 = vmatmul.msk.f32.gmra.mxu2 %vm1096_vm7, %v1080_v16  ;;  %v1085_v37 = vsel %vm1058_vm6, %v1052_v33, %v982_v6 }
 0x1cf   : > { %1541 = vmatmul.msk.f32.gmra.mxu3 %vm1096_vm7, %v1085_v37 }
 0x1d4   : > { %v940_v54 = vpop.permute.xlu0 %939 }
 0x1d5   : > { %v950_v32 = vpop.permute.xlu1 %949  ;;  %v1064_v27 = vsel %vm1058_vm6, %v1031_v41, %v940_v54 }
 0x1d6   : > { %1520 = vmatmul.msk.f32.gmra.mxu0 %vm1096_vm7, %v1064_v27  ;;  %v1069_v59 = vsel %vm1058_vm6, %v1036_v18, %v950_v32 }
 0x1d7   : > { %1525 = vmatmul.msk.f32.gmra.mxu1 %vm1096_vm7, %v1069_v59 }
 0x1dc   : > { %v886_v17 = vpop.permute.xlu0 %885 }
 0x1dd   : > { %v974_v29 = vpop.permute.xlu1 %973  ;;  %v1053_v49 = vsel %vm1025_vm5, %v2364_v28, %v886_v17 }
 0x1de   : > { %v1081_v45 = vsel %vm1058_vm6, %v1048_v30, %v974_v29  ;;  %v1086_v10 = vsel %vm1058_vm6, %v1053_v49, %v984_v7 }
 0x1df   : > { %1537 = vmatmul.msk.f32.gmra.mxu2 %vm1096_vm7, %v1081_v45  ;;  %1542 = vmatmul.msk.f32.gmra.mxu3 %vm1096_vm7, %v1086_v10 }
 0x1e3   : > { %v1214_v12 = vpop.f32.mrf.mxu0 }
 0x1e4   : > { %1310 = vxpose.xlu1.b32.start [1/16] (narrow) %v1214_v12, 8  ;;  %v854_v62 = vpop.permute.xlu0 %853 }
 0x1e5   : > { %v942_v31 = vpop.permute.xlu1 %941  ;;  %v1037_v28 = vsel %vm1025_vm5, %v2151_v23, %v854_v62 }
 0x1e6   : > { %v1065_v13 = vsel %vm1058_vm6, %v1032_v47, %v942_v31  ;;  %v1070_v3 = vsel %vm1058_vm6, %v1037_v28, %v952_v11 }
 0x1e7   : > { %1521 = vmatmul.msk.f32.gmra.mxu0 %vm1096_vm7, %v1065_v13  ;;  %1526 = vmatmul.msk.f32.gmra.mxu1 %vm1096_vm7, %v1070_v3 }
 0x1eb   : > { %v1217_v14 = vpop.f32.mrf.mxu0 }
 0x1ec   : > { %1311 = vxpose.xlu1.b32.cont [2/16] (narrow) %v1217_v14, 8  ;;  %v878_v36 = vpop.permute.xlu0 %877 }
 0x1ed   : > { %v888_v25 = vpop.permute.xlu1 %887  ;;  %v1049_v23 = vsel %vm1025_vm5, %v2277_v21, %v878_v36  ;;  %v988_v21 = vpop.permute.xlu2 %987 }
 0x1ee   : > { %v1082_v26 = vsel %vm1058_vm6, %v1049_v23, %v976_v34  ;;  %v1054_v50 = vsel %vm1025_vm5, %v2339_v38, %v888_v25 }
 0x1ef   : > { %1522 = vmatmul.msk.f32.gmra.mxu0 %vm1096_vm7, %v1066_v20  ;;  %1538 = vmatmul.msk.f32.gmra.mxu2 %vm1096_vm7, %v1082_v26 }
 0x1f3   : > { %v1220_v2 = vpop.f32.mrf.mxu0 }
 0x1f4   : > { %1312 = vxpose.xlu1.b32.cont [3/16] (narrow) %v1220_v2, 8  ;;  %v986_v46 = vpop.permute.xlu0 %985 }
 0x1f5   : > { %v856_v53 = vpop.permute.xlu1 %855  ;;  %v1087_v24 = vsel %vm1058_vm6, %v1054_v50, %v986_v46  ;;  %v892_v22 = vpop.permute.xlu2 %891 }
 0x1f6   : > { %1543 = vmatmul.msk.f32.gmra.mxu3 %vm1096_vm7, %v1087_v24  ;;  %v1038_v56 = vsel %vm1025_vm5, %v2304_v0, %v856_v53  ;;  %v1056_v44 = vsel %vm1025_vm5, %v2416_v57, %v892_v22 }
 0x1fc   : > { %v954_v5 = vpop.permute.xlu0 %953 }
 0x1fd   : > { %v890_v19 = vpop.permute.xlu1 %889  ;;  %v1071_v52 = vsel %vm1058_vm6, %v1038_v56, %v954_v5  ;;  %v958_v40 = vpop.permute.xlu2 %957 }
 0x1fe   : > { %v1055_v61 = vsel %vm1025_vm5, %v2379_v39, %v890_v19  ;;  %1527 = vmatmul.msk.f32.gmra.mxu1 %vm1096_vm7, %v1071_v52 }
 0x1ff   : > { %v1088_v38 = vsel %vm1058_vm6, %v1055_v61, %v988_v21 }
 0x200   : > { %1544 = vmatmul.msk.f32.gmra.mxu3 %vm1096_vm7, %v1088_v38 }
 0x203   : > { %v1238_v29 = vpop.f32.mrf.mxu1 }
 0x204   : > { %v858_v51 = vpop.permute.xlu0 %857 }
 0x205   : > { %v956_v35 = vpop.permute.xlu1 %955  ;;  %v1039_v15 = vsel %vm1025_vm5, %v2229_v9, %v858_v51  ;;  %v862_v6 = vpop.permute.xlu2 %861 }
 0x206   : > { %v1072_v0 = vsel %vm1058_vm6, %v1039_v15, %v956_v35 }
 0x207   : > { %1528 = vmatmul.msk.f32.gmra.mxu1 %vm1096_vm7, %v1072_v0 }
 0x20c   : > { %v990_v39 = vpop.permute.xlu0 %989 }
 0x20d   : > { %v860_v43 = vpop.permute.xlu1 %859  ;;  %v1089_v55 = vsel %vm1058_vm6, %v1056_v44, %v990_v39 }
 0x20e   : > { %v1040_v60 = vsel %vm1025_vm5, %v2169_v1, %v860_v43  ;;  %1545 = vmatmul.msk.f32.gmra.mxu3 %vm1096_vm7, %v1089_v55  ;;  %v1041_v1 = vsel %vm1025_vm5, %v2242_v48, %v862_v6 }
 0x20f   : > { %v1073_v42 = vsel %vm1058_vm6, %v1040_v60, %v958_v40 }
 0x210   : > { %1529 = vmatmul.msk.f32.gmra.mxu1 %vm1096_vm7, %v1073_v42 }
 0x212   : > { %v1262_v9 = vpop.f32.mrf.mxu2 }
 0x213   : > { %1342 = vxpose.xlu2.b32.start [1/16] (narrow) %v1262_v9, 8 }
 0x214   : > { %v894_v58 = vpop.permute.xlu0 %893 }
 0x215   : > { %v992_v33 = vpop.permute.xlu1 %991  ;;  %v1057_v57 = vsel %vm1025_vm5, %v2409_v8, %v894_v58 }
 0x216   : > { %v1090_v7 = vsel %vm1058_vm6, %v1057_v57, %v992_v33 }
 0x217   : > { %1546 = vmatmul.msk.f32.gmra.mxu3 %vm1096_vm7, %v1090_v7 }
 0x21a   : > { %v1265_v16 = vpop.f32.mrf.mxu2 }
 0x21b   : > { %1343 = vxpose.xlu2.b32.cont [2/16] (narrow) %v1265_v16, 8 }
 0x21c   : > { %v960_v37 = vpop.permute.xlu0 %959 }
 0x21d   : > { %v1074_v41 = vsel %vm1058_vm6, %v1041_v1, %v960_v37 }
 0x21e   : > { %1530 = vmatmul.msk.f32.gmra.mxu1 %vm1096_vm7, %v1074_v41 }
 0x222   : > { %v1268_v54 = vpop.f32.mrf.mxu2 }
 0x223   : > { %1344 = vxpose.xlu2.b32.cont [3/16] (narrow) %v1268_v54, 8 }
 0x22a   : > { %v1271_v18 = vpop.f32.mrf.mxu2 }
 0x22b   : > { %1345 = vxpose.xlu2.b32.cont [4/16] (narrow) %v1271_v18, 8 }
 0x22c   : > { %v1223_v8 = vpop.f32.mrf.mxu0 }
 0x22d   : > { %1313 = vxpose.xlu1.b32.cont [4/16] (narrow) %v1223_v8, 8 }
 0x231   : > { %v1286_v45 = vpop.f32.mrf.mxu3 }
 0x234   : > { %v1226_v32 = vpop.f32.mrf.mxu0 }
 0x235   : > { %1314 = vxpose.xlu1.b32.cont [5/16] (narrow) %v1226_v32, 8 }
 0x23a   : > { %v1274_v27 = vpop.f32.mrf.mxu2 }
 0x23b   : > { %1346 = vxpose.xlu2.b32.cont [5/16] (narrow) %v1274_v27, 8 }
 0x241   : > { %v1289_v34 = vpop.f32.mrf.mxu3 }
 0x243   : > { %v1241_v10 = vpop.f32.mrf.mxu1 }
 0x251   : > { %v1277_v59 = vpop.f32.mrf.mxu2 }
 0x252   : > { %1347 = vxpose.xlu2.b32.cont [6/16] (narrow) %v1277_v59, 8  ;;  %v1292_v62 = vpop.f32.mrf.mxu3 }
 0x253   : > { %v1229_v11 = vpop.f32.mrf.mxu0 }
 0x254   : > { %1315 = vxpose.xlu1.b32.cont [6/16] (narrow) %v1229_v11, 8  ;;  %v1244_v12 = vpop.f32.mrf.mxu1 }
 0x262   : > { %v1280_v48 = vpop.f32.mrf.mxu2  ;;  %v1295_v31 = vpop.f32.mrf.mxu3 }
 0x263   : > { %1348 = vxpose.xlu2.b32.cont [7/16] (narrow) %v1280_v48, 8 }
 0x264   : > { %v1232_v17 = vpop.f32.mrf.mxu0  ;;  %v1247_v47 = vpop.f32.mrf.mxu1 }
 0x265   : > { %1316 = vxpose.xlu1.b32.cont [7/16] (narrow) %v1232_v17, 8 }
 0x26c   : > { %v1235_v30 = vpop.f32.mrf.mxu0 }
 0x26d   : > { %1317 = vxpose.xlu1.b32.cont [8/16] (narrow) %v1235_v30, 8 }
 0x272   : > { %v1283_v49 = vpop.f32.mrf.mxu2 }
 0x273   : > { %1349 = vxpose.xlu2.b32.cont [8/16] (narrow) %v1283_v49, 8 }
 0x275   : > { %1318 = vxpose.xlu1.b32.cont [9/16] (narrow) %v1238_v29, 8 }
 0x279   : > { %v1298_v13 = vpop.f32.mrf.mxu3 }
 0x27b   : > { %1350 = vxpose.xlu2.b32.cont [9/16] (narrow) %v1286_v45, 8  ;;  %v1250_v28 = vpop.f32.mrf.mxu1 }
 0x27d   : > { %1319 = vxpose.xlu1.b32.cont [10/16] (narrow) %v1241_v10, 8 }
 0x283   : > { %1351 = vxpose.xlu2.b32.cont [10/16] (narrow) %v1289_v34, 8  ;;  %v1301_v63 = vpop.f32.mrf.mxu3 }
 0x284   : > { %v1253_v3 = vpop.f32.mrf.mxu1 }
 0x285   : > { %1320 = vxpose.xlu1.b32.cont [11/16] (narrow) %v1244_v12, 8 }
 0x28b   : > { %1352 = vxpose.xlu2.b32.cont [11/16] (narrow) %v1292_v62, 8 }
 0x28d   : > { %1321 = vxpose.xlu1.b32.cont [12/16] (narrow) %v1247_v47, 8  ;;  %v1256_v14 = vpop.f32.mrf.mxu1 }
 0x291   : > { %v1304_v36 = vpop.f32.mrf.mxu3 }
 0x293   : > { %1353 = vxpose.xlu2.b32.cont [12/16] (narrow) %v1295_v31, 8 }
 0x295   : > { %1322 = vxpose.xlu1.b32.cont [13/16] (narrow) %v1250_v28, 8 }
 0x29a   : > { %v1307_v25 = vpop.f32.mrf.mxu3 }
 0x29b   : > { %1354 = vxpose.xlu2.b32.cont [13/16] (narrow) %v1298_v13, 8  ;;  %v1259_v4 = vpop.f32.mrf.mxu1 }
 0x29d   : > { %1323 = vxpose.xlu1.b32.cont [14/16] (narrow) %v1253_v3, 8 }
 0x2a3   : > { %1355 = vxpose.xlu2.b32.cont [14/16] (narrow) %v1301_v63, 8 }
 0x2a5   : > { %1324 = vxpose.xlu1.b32.cont [15/16] (narrow) %v1256_v14, 8 }
 0x2ab   : > { %1356 = vxpose.xlu2.b32.cont [15/16] (narrow) %v1304_v36, 8 }
 0x2ad   : > { %1325 = vxpose.xlu1.b32.end [16/16] (narrow) %v1259_v4, 8 }
 0x2b3   : > { %1357 = vxpose.xlu2.b32.end [16/16] (narrow) %v1307_v25, 8 }
 0x2d4   : > { %v1358_v23 = vpop.trf.xlu2 }
 0x2d5   : > { %1375 = vst [vmem:[%s210_s12 + $0x8] sm:$0xff] %v1358_v23  ;;  %v1382_v2 = vmul.f32 %v1358_v23, %v1358_v23 }
 0x2d9   : > { %v1326_v20 = vpop.trf.xlu1 }
 0x2da   : > { %1374 = vst [vmem:[%s210_s12] sm:$0xff] %v1326_v20  ;;  %v1376_v26 = vadd.f32 %v1358_v23, %v1326_v20  ;;  %v1381_v50 = vmul.f32 %v1326_v20, %v1326_v20 }
 0x2dc   : > { %1377 = vadd.xlane.f32.xlu0 %v1376_v26  ;;  %v1383_v46 = vadd.f32 %v1382_v2, %v1381_v50 }
 0x2e4   : > { %1384 = vadd.xlane.f32.xlu0 %v1383_v46 }
 0x34f   : > { %v1378_v53 = vpop.xlane.xlu0 %1377 }
 0x350   : > { %1380 = vst.msk [vmem:[%s214_s18] sm:$0xff] %vm1379_vm8, %v1378_v53 }
 0x357   : > { %v1385_v24 = vpop.xlane.xlu0 %1384 }
 0x358   : > { %1386 = vst.msk [vmem:[%s218_s21] sm:$0xff] %vm1379_vm8, %v1385_v24 }
 0x359 PF: > { %s15_s15 = sadd.s32 1, %s1584_s15  }
 0x35a   : > { %p12_p4 = scmp.ge.s32.totalorder %s15_s15, 4  }
 0x35c   :  { %14 = sbr.rel (!%p12_p4) target bundleno = 1 (0x1), region = 82 }

</bundles_post_ra>
